<compile_context>
chip_gen: v5e
topology: v5e:2x2
jax: 0.10.0
libtpu: 0.0.40
codegen_flags: <defaults>
</compile_context>

<pallas_src>
import jax
import jax.numpy as jnp
from jax.experimental import pallas as pl
from jax.experimental.pallas import tpu as pltpu

# ----------------------- configuration ---------------------------------
D_MODEL    = 32
NHEAD      = 4
HEAD_DIM   = D_MODEL // NHEAD
DIM_FF     = 64
ATTN_ALPHA = 0.5          # scalar attn_alpha hyper-parameter of the module
LN_EPS     = 1e-5


# ----------------------- fused Pallas kernel ----------------------------
def decoder_layer_kernel(tgt_ref, per_ref, mem_ref,
                         hmask_ref, smask_ref,
                         wq_ref, bq_ref, wk_ref, bk_ref, wv_ref, bv_ref,
                         wo_ref, bo3_ref,
                         ln2g_ref, ln2b_ref, ln1g_ref, ln1b_ref,
                         w1_ref, b1_ref, w2_ref, b2_ref,
                         o_ref):
    """Whole decoder layer for one block of query rows, fully VMEM-resident.

    Row layout is opaque to the kernel: the host builds `hmask` (block-diagonal
    (head-row, head-lane) mask) and `smask` (3 x (batch-match & source-segment)
    masks over the fused key axis) consistently with whatever (seq, batch)
    ordering it chose, so the same body serves the batch-folded and the
    per-batch grid strategies.
    """
    nq, D = tgt_ref.shape                      # nq = (#batch in block) * L

    def layer_norm(x, g, b):
        mu = jnp.mean(x, axis=-1, keepdims=True)
        var = jnp.mean((x - mu) ** 2, axis=-1, keepdims=True)
        return (x - mu) * jax.lax.rsqrt(var + LN_EPS) * g + b

    # --- tgt = norm2(tgt) ---
    tgt_n = layer_norm(tgt_ref[...], ln2g_ref[...], ln2b_ref[...])           # (nq, D)

    # --- Q once (1/sqrt(head_dim) already folded into wq/bq) ---
    q = jnp.dot(tgt_n, wq_ref[...], preferred_element_type=jnp.float32) + bq_ref[...]

    # --- fused K/V projection for [tgt_n ; persona ; memory] ---
    src_all = jnp.concatenate([tgt_n, per_ref[...], mem_ref[...]], axis=0)   # (nkv, D)
    k_all = jnp.dot(src_all, wk_ref[...], preferred_element_type=jnp.float32) + bk_ref[...]
    v_all = jnp.dot(src_all, wv_ref[...], preferred_element_type=jnp.float32) + bv_ref[...]

    # --- heads stacked along sublanes; block-diag head mask precomputed on host
    hm = hmask_ref[...]                                                      # (NHEAD*nq, D)
    q_st = jnp.concatenate([q] * NHEAD, axis=0) * hm                         # (NHEAD*nq, D)

    # --- ONE score matmul for all (head, batch, source) combinations ---
    s = jax.lax.dot_general(q_st, k_all, (((1,), (1,)), ((), ())),
                            preferred_element_type=jnp.float32)              # (NHEAD*nq, nkv)

    m0 = smask_ref[0]        # self-attn columns of the same batch   (coef 1)
    m1 = smask_ref[1]        # persona columns of the same batch     (coef alpha)
    m2 = smask_ref[2]        # memory  columns of the same batch     (coef 2-alpha)
    valid = m0 + m1 + m2
    s = jnp.where(valid > 0.5, s, -1e30)
    e = jnp.exp(s - jnp.max(s, axis=-1, keepdims=True))

    # per-source softmax denominators, merge coefficients folded into the probs
    d0 = jnp.sum(e * m0, axis=-1, keepdims=True)
    d1 = jnp.sum(e * m1, axis=-1, keepdims=True)
    d2 = jnp.sum(e * m2, axis=-1, keepdims=True)
    col_w = (m0 * pl.reciprocal(d0, approx=True)
             + ATTN_ALPHA * m1 * pl.reciprocal(d1, approx=True)
             + (2.0 - ATTN_ALPHA) * m2 * pl.reciprocal(d2, approx=True))
    p = e * col_w                                                            # (NHEAD*nq, nkv)

    # --- ONE PV matmul, one head-mask multiply, one head fold ---
    o = jnp.dot(p, v_all, preferred_element_type=jnp.float32) * hm           # (NHEAD*nq, D)
    acc = o[0:nq]
    for h in range(1, NHEAD):                       # aligned sublane slices (free)
        acc = acc + o[h * nq:(h + 1) * nq]

    # out_proj is linear -> single matmul for the merged branches; bias appears 3x
    merged = jnp.dot(acc, wo_ref[...], preferred_element_type=jnp.float32) + bo3_ref[...]

    x = tgt_n + merged                              # residual vs norm2(tgt); dropout = id
    y = layer_norm(x, ln1g_ref[...], ln1b_ref[...])  # norm1

    # --- FFN: linear2(relu(linear1(y))) + residual ---
    h1 = jnp.maximum(
        jnp.dot(y, w1_ref[...], preferred_element_type=jnp.float32) + b1_ref[...], 0.0)
    y2 = jnp.dot(h1, w2_ref[...], preferred_element_type=jnp.float32) + b2_ref[...]
    o_ref[...] = y + y2


# ----------------------- host-side mask builder --------------------------
def _build_masks(q_batch, kv_batch, kv_seg):
    """Precompute head mask and (batch-match & source-segment) score masks."""
    nq = q_batch.shape[0]
    row_batch = jnp.tile(q_batch, NHEAD)                          # rows are head-major
    same = row_batch[:, None] == kv_batch[None, :]
    smask = jnp.stack(
        [(same & (kv_seg[None, :] == j)).astype(jnp.float32) for j in range(3)],
        axis=0)                                                   # (3, NHEAD*nq, nkv)
    head_of_row = jnp.repeat(jnp.arange(NHEAD, dtype=jnp.int32), nq)
    head_of_lane = jnp.arange(D_MODEL, dtype=jnp.int32) // HEAD_DIM
    hmask = (head_of_row[:, None] == head_of_lane[None, :]).astype(jnp.float32)
    return hmask, smask


def _multi_tensorcore_chip():
    """True on chips with >1 TensorCore per device (v7x / megacore), else False."""
    try:
        kind = jax.devices()[0].device_kind.lower()
    except Exception:
        return False
    return any(t in kind for t in ("v7", "tpu7", "v4", "v5p"))


# ----------------------- wrapper (single pallas_call) -------------------
def transformer_decoder_layer(tgt, memory, persona, params, *, per_batch_grid=None):
    """tgt: (L, B, D), memory: (S_m, B, D), persona: (S_p, B, D) — PyTorch layout."""
    L, B, D = tgt.shape
    S_m = memory.shape[0]
    S_p = persona.shape[0]
    F = DIM_FF

    if per_batch_grid is None:
        per_batch_grid = _multi_tensorcore_chip() and B > 1

    if per_batch_grid:
        # v7x-style: one batch element per grid step, each TensorCore takes one.
        tgt_in = jnp.transpose(tgt, (1, 0, 2))        # (B, L, D)
        per_in = jnp.transpose(persona, (1, 0, 2))    # (B, S_p, D)
        mem_in = jnp.transpose(memory, (1, 0, 2))     # (B, S_m, D)
        nq, npp, nm = L, S_p, S_m
        grid = (B,)
        tgt_spec = pl.BlockSpec((None, L, D), lambda b: (b, 0, 0))
        per_spec = pl.BlockSpec((None, S_p, D), lambda b: (b, 0, 0))
        mem_spec = pl.BlockSpec((None, S_m, D), lambda b: (b, 0, 0))
        out_shape = jax.ShapeDtypeStruct((B, L, D), jnp.float32)
        out_spec = pl.BlockSpec((None, L, D), lambda b: (b, 0, 0))
        q_batch = jnp.zeros((nq,), jnp.int32)
        kv_batch = jnp.zeros((nq + npp + nm,), jnp.int32)
        kv_seg = jnp.concatenate([jnp.full((L,), 0, jnp.int32),
                                  jnp.full((S_p,), 1, jnp.int32),
                                  jnp.full((S_m,), 2, jnp.int32)])
        sem = ("parallel",)
    else:
        # Single-TC chips (v5e/v6e): fold the whole batch into ONE grid step.
        # Native (seq, batch) row order -> pure reshapes, no transposes.
        tgt_in = tgt.reshape(L * B, D)
        per_in = persona.reshape(S_p * B, D)
        mem_in = memory.reshape(S_m * B, D)
        nq, npp, nm = L * B, S_p * B, S_m * B
        grid = (1,)
        tgt_spec = pl.BlockSpec((nq, D), lambda b: (0, 0))
        per_spec = pl.BlockSpec((npp, D), lambda b: (0, 0))
        mem_spec = pl.BlockSpec((nm, D), lambda b: (0, 0))
        out_shape = jax.ShapeDtypeStruct((nq, D), jnp.float32)
        out_spec = pl.BlockSpec((nq, D), lambda b: (0, 0))
        bids = jnp.arange(B, dtype=jnp.int32)
        q_batch = jnp.tile(bids, L)                   # row r of (L,B,D) flat -> r % B
        kv_batch = jnp.concatenate([jnp.tile(bids, L),
                                    jnp.tile(bids, S_p),
                                    jnp.tile(bids, S_m)])
        kv_seg = jnp.concatenate([jnp.full((L * B,), 0, jnp.int32),
                                  jnp.full((S_p * B,), 1, jnp.int32),
                                  jnp.full((S_m * B,), 2, jnp.int32)])
        sem = ("arbitrary",)

    hmask, smask = _build_masks(q_batch, kv_batch, kv_seg)
    rows = NHEAD * nq
    nkv = nq + npp + nm

    def inv(shape):
        nd = len(shape)
        return pl.BlockSpec(shape, lambda b, _nd=nd: (0,) * _nd)

    out = pl.pallas_call(
        decoder_layer_kernel,
        out_shape=out_shape,
        grid=grid,
        in_specs=[
            tgt_spec, per_spec, mem_spec,
            inv((rows, D)),                 # head mask
            inv((3, rows, nkv)),            # segment/batch masks
            inv((D, D)), inv((1, D)),       # wq_scaled_t, bq_scaled
            inv((D, D)), inv((1, D)),       # wk_t, bk
            inv((D, D)), inv((1, D)),       # wv_t, bv
            inv((D, D)), inv((1, D)),       # wo_t, 3*bo
            inv((1, D)), inv((1, D)),       # ln2 gamma, beta
            inv((1, D)), inv((1, D)),       # ln1 gamma, beta
            inv((D, F)), inv((1, F)),       # w1_t, b1
            inv((F, D)), inv((1, D)),       # w2_t, b2
        ],
        out_specs=out_spec,
        compiler_params=pltpu.CompilerParams(dimension_semantics=sem),
    )(tgt_in, per_in, mem_in, hmask, smask,
      params["wq_s_t"], params["bq_s"],
      params["wk_t"], params["bk"],
      params["wv_t"], params["bv"],
      params["wo_t"], params["bo3"],
      params["ln2_g"], params["ln2_b"],
      params["ln1_g"], params["ln1_b"],
      params["w1_t"], params["b1"],
      params["w2_t"], params["b2"])

    if per_batch_grid:
        out = jnp.transpose(out, (1, 0, 2))           # (B,L,D) -> (L,B,D)
    else:
        out = out.reshape(L, B, D)                    # free reshape, already (L,B) major

    return out, jnp.float32(ATTN_ALPHA)


# ----------------------- deterministic params ---------------------------
def init_params():
    key = jax.random.PRNGKey(0)
    ks = jax.random.split(key, 8)

    def rnd(k, shape, scale=0.05):
        return jax.random.normal(k, shape, dtype=jnp.float32) * scale

    in_proj_w = rnd(ks[0], (3 * D_MODEL, D_MODEL))    # as in nn.MultiheadAttention
    in_proj_b = rnd(ks[1], (3 * D_MODEL,))
    out_proj_w = rnd(ks[2], (D_MODEL, D_MODEL))
    out_proj_b = rnd(ks[3], (D_MODEL,))
    w1 = rnd(ks[4], (DIM_FF, D_MODEL))                # nn.Linear(d_model, dim_ff)
    b1 = rnd(ks[5], (DIM_FF,))
    w2 = rnd(ks[6], (D_MODEL, DIM_FF))                # nn.Linear(dim_ff, d_model)
    b2 = rnd(ks[7], (D_MODEL,))

    scale = HEAD_DIM ** -0.5                          # folded softmax scaling
    wq = in_proj_w[0:D_MODEL]
    wk = in_proj_w[D_MODEL:2 * D_MODEL]
    wv = in_proj_w[2 * D_MODEL:3 * D_MODEL]
    bq = in_proj_b[0:D_MODEL]
    bk = in_proj_b[D_MODEL:2 * D_MODEL]
    bv = in_proj_b[2 * D_MODEL:3 * D_MODEL]

    row = lambda v: v.reshape(1, -1)                  # pre-shaped once (review item)
    return {
        # pre-transposed so the kernel computes x @ W_t + b  (== F.linear(x, W, b))
        "wq_s_t": (wq * scale).T, "bq_s": row(bq * scale),
        "wk_t": wk.T, "bk": row(bk),
        "wv_t": wv.T, "bv": row(bv),
        "wo_t": out_proj_w.T, "bo3": row(3.0 * out_proj_b),
        "w1_t": w1.T, "b1": row(b1),
        "w2_t": w2.T, "b2": row(b2),
        "ln1_g": row(jnp.ones((D_MODEL,), jnp.float32)),
        "ln1_b": row(jnp.zeros((D_MODEL,), jnp.float32)),
        "ln2_g": row(jnp.ones((D_MODEL,), jnp.float32)),
        "ln2_b": row(jnp.zeros((D_MODEL,), jnp.float32)),
    }


# ----------------------- main -------------------------------------------
if __name__ == "__main__":
    L, S_MEM, S_PER, B = 8, 8, 8, 2

    key = jax.random.PRNGKey(0)
    k1, k2, k3 = jax.random.split(key, 3)
    tgt = jax.random.normal(k1, (L, B, D_MODEL), dtype=jnp.float32)
    memory = jax.random.normal(k2, (S_MEM, B, D_MODEL), dtype=jnp.float32)
    persona = jax.random.normal(k3, (S_PER, B, D_MODEL), dtype=jnp.float32)

    params = init_params()

    auto_pb = _multi_tensorcore_chip()
    out, alpha = transformer_decoder_layer(tgt, memory, persona, params,
                                           per_batch_grid=auto_pb)
    out = jax.block_until_ready(out)
    assert out.shape == (L, B, D_MODEL)
    assert out.dtype == jnp.float32

    # Exercise the other batching strategy too and cross-check the two paths.
    out2, _ = transformer_decoder_layer(tgt, memory, persona, params,
                                        per_batch_grid=not auto_pb)
    out2 = jax.block_until_ready(out2)
    assert bool(jnp.allclose(out, out2, rtol=1e-3, atol=1e-3))

    print("KERNEL_OK")
</pallas_src>

<mosaic_0001>
module attributes {stable_mosaic.version = 11 : i64} {
  func.func @decoder_layer_kernel(%arg0: i32, %arg1: memref<16x32xf32, #tpu.memory_space<vmem>>, %arg2: memref<16x32xf32, #tpu.memory_space<vmem>>, %arg3: memref<16x32xf32, #tpu.memory_space<vmem>>, %arg4: memref<64x32xf32, #tpu.memory_space<vmem>>, %arg5: memref<3x64x48xf32, #tpu.memory_space<vmem>>, %arg6: memref<32x32xf32, #tpu.memory_space<vmem>>, %arg7: memref<1x32xf32, #tpu.memory_space<vmem>>, %arg8: memref<32x32xf32, #tpu.memory_space<vmem>>, %arg9: memref<1x32xf32, #tpu.memory_space<vmem>>, %arg10: memref<32x32xf32, #tpu.memory_space<vmem>>, %arg11: memref<1x32xf32, #tpu.memory_space<vmem>>, %arg12: memref<32x32xf32, #tpu.memory_space<vmem>>, %arg13: memref<1x32xf32, #tpu.memory_space<vmem>>, %arg14: memref<1x32xf32, #tpu.memory_space<vmem>>, %arg15: memref<1x32xf32, #tpu.memory_space<vmem>>, %arg16: memref<1x32xf32, #tpu.memory_space<vmem>>, %arg17: memref<1x32xf32, #tpu.memory_space<vmem>>, %arg18: memref<32x64xf32, #tpu.memory_space<vmem>>, %arg19: memref<1x64xf32, #tpu.memory_space<vmem>>, %arg20: memref<64x32xf32, #tpu.memory_space<vmem>>, %arg21: memref<1x32xf32, #tpu.memory_space<vmem>>, %arg22: memref<16x32xf32, #tpu.memory_space<vmem>>) attributes {dimension_semantics = [#tpu.dimension_semantics<arbitrary>], iteration_bounds = array<i64: 1>, scalar_prefetch = 0 : i64, scratch_operands = 0 : i64, tpu.core_type = #tpu.core_type<tc>, window_params = [{pipeline_mode = #tpu.pipeline_mode<synchronous>, transform_indices = @transform_0, window_bounds = array<i64: 16, 32>}, {pipeline_mode = #tpu.pipeline_mode<synchronous>, transform_indices = @transform_1, window_bounds = array<i64: 16, 32>}, {pipeline_mode = #tpu.pipeline_mode<synchronous>, transform_indices = @transform_2, window_bounds = array<i64: 16, 32>}, {pipeline_mode = #tpu.pipeline_mode<synchronous>, transform_indices = @transform_3, window_bounds = array<i64: 64, 32>}, {pipeline_mode = #tpu.pipeline_mode<synchronous>, transform_indices = @transform_4, window_bounds = array<i64: 3, 64, 48>}, {pipeline_mode = #tpu.pipeline_mode<synchronous>, transform_indices = @transform_5, window_bounds = array<i64: 32, 32>}, {pipeline_mode = #tpu.pipeline_mode<synchronous>, transform_indices = @transform_6, window_bounds = array<i64: 1, 32>}, {pipeline_mode = #tpu.pipeline_mode<synchronous>, transform_indices = @transform_7, window_bounds = array<i64: 32, 32>}, {pipeline_mode = #tpu.pipeline_mode<synchronous>, transform_indices = @transform_8, window_bounds = array<i64: 1, 32>}, {pipeline_mode = #tpu.pipeline_mode<synchronous>, transform_indices = @transform_9, window_bounds = array<i64: 32, 32>}, {pipeline_mode = #tpu.pipeline_mode<synchronous>, transform_indices = @transform_10, window_bounds = array<i64: 1, 32>}, {pipeline_mode = #tpu.pipeline_mode<synchronous>, transform_indices = @transform_11, window_bounds = array<i64: 32, 32>}, {pipeline_mode = #tpu.pipeline_mode<synchronous>, transform_indices = @transform_12, window_bounds = array<i64: 1, 32>}, {pipeline_mode = #tpu.pipeline_mode<synchronous>, transform_indices = @transform_13, window_bounds = array<i64: 1, 32>}, {pipeline_mode = #tpu.pipeline_mode<synchronous>, transform_indices = @transform_14, window_bounds = array<i64: 1, 32>}, {pipeline_mode = #tpu.pipeline_mode<synchronous>, transform_indices = @transform_15, window_bounds = array<i64: 1, 32>}, {pipeline_mode = #tpu.pipeline_mode<synchronous>, transform_indices = @transform_16, window_bounds = array<i64: 1, 32>}, {pipeline_mode = #tpu.pipeline_mode<synchronous>, transform_indices = @transform_17, window_bounds = array<i64: 32, 64>}, {pipeline_mode = #tpu.pipeline_mode<synchronous>, transform_indices = @transform_18, window_bounds = array<i64: 1, 64>}, {pipeline_mode = #tpu.pipeline_mode<synchronous>, transform_indices = @transform_19, window_bounds = array<i64: 64, 32>}, {pipeline_mode = #tpu.pipeline_mode<synchronous>, transform_indices = @transform_20, window_bounds = array<i64: 1, 32>}, {pipeline_mode = #tpu.pipeline_mode<synchronous>, transform_indices = @transform_21, window_bounds = array<i64: 16, 32>}]} {
    %c0 = arith.constant 0 : index
    %c0_0 = arith.constant 0 : index
    %0 = vector.load %arg1[%c0, %c0_0] : memref<16x32xf32, #tpu.memory_space<vmem>>, vector<16x32xf32>
    %c0_1 = arith.constant 0 : index
    %c0_2 = arith.constant 0 : index
    %1 = vector.load %arg14[%c0_1, %c0_2] : memref<1x32xf32, #tpu.memory_space<vmem>>, vector<1x32xf32>
    %c0_3 = arith.constant 0 : index
    %c0_4 = arith.constant 0 : index
    %2 = vector.load %arg15[%c0_3, %c0_4] : memref<1x32xf32, #tpu.memory_space<vmem>>, vector<1x32xf32>
    %cst = arith.constant dense<0.000000e+00> : vector<16xf32>
    %3 = vector.multi_reduction <add>, %0, %cst [1] : vector<16x32xf32> to vector<16xf32>
    %4 = vector.shape_cast %3 : vector<16xf32> to vector<16x1xf32>
    %cst_5 = arith.constant 3.200000e+01 : f32
    %5 = vector.broadcast %cst_5 : f32 to vector<16x1xf32>
    %6 = arith.divf %4, %5 : vector<16x1xf32>
    %7 = vector.broadcast %6 : vector<16x1xf32> to vector<16x32xf32>
    %8 = arith.subf %0, %7 : vector<16x32xf32>
    %9 = arith.mulf %8, %8 : vector<16x32xf32>
    %cst_6 = arith.constant dense<0.000000e+00> : vector<16xf32>
    %10 = vector.multi_reduction <add>, %9, %cst_6 [1] : vector<16x32xf32> to vector<16xf32>
    %11 = vector.shape_cast %10 : vector<16xf32> to vector<16x1xf32>
    %cst_7 = arith.constant 3.200000e+01 : f32
    %12 = vector.broadcast %cst_7 : f32 to vector<16x1xf32>
    %13 = arith.divf %11, %12 : vector<16x1xf32>
    %14 = vector.broadcast %6 : vector<16x1xf32> to vector<16x32xf32>
    %15 = arith.subf %0, %14 : vector<16x32xf32>
    %cst_8 = arith.constant 9.99999974E-6 : f32
    %16 = vector.broadcast %cst_8 : f32 to vector<16x1xf32>
    %17 = arith.addf %13, %16 : vector<16x1xf32>
    %18 = math.rsqrt %17 : vector<16x1xf32>
    %19 = vector.broadcast %18 : vector<16x1xf32> to vector<16x32xf32>
    %20 = arith.mulf %15, %19 : vector<16x32xf32>
    %21 = vector.broadcast %1 : vector<1x32xf32> to vector<16x32xf32>
    %22 = arith.mulf %20, %21 : vector<16x32xf32>
    %23 = vector.broadcast %2 : vector<1x32xf32> to vector<16x32xf32>
    %24 = arith.addf %22, %23 : vector<16x32xf32>
    %c0_9 = arith.constant 0 : index
    %c0_10 = arith.constant 0 : index
    %25 = vector.load %arg6[%c0_9, %c0_10] : memref<32x32xf32, #tpu.memory_space<vmem>>, vector<32x32xf32>
    %cst_11 = arith.constant dense<0.000000e+00> : vector<16x32xf32>
    %26 = tpu.matmul %24, %25, %cst_11 {dimension_numbers = #tpu.dot_dimension_numbers<[1], [0], [0], [1], [0, 0, 1, 1], [], []>} : vector<16x32xf32>, vector<32x32xf32>, vector<16x32xf32> -> vector<16x32xf32>
    %c0_12 = arith.constant 0 : index
    %c0_13 = arith.constant 0 : index
    %27 = vector.load %arg7[%c0_12, %c0_13] : memref<1x32xf32, #tpu.memory_space<vmem>>, vector<1x32xf32>
    %28 = vector.broadcast %27 : vector<1x32xf32> to vector<16x32xf32>
    %29 = arith.addf %26, %28 : vector<16x32xf32>
    %c0_14 = arith.constant 0 : index
    %c0_15 = arith.constant 0 : index
    %30 = vector.load %arg2[%c0_14, %c0_15] : memref<16x32xf32, #tpu.memory_space<vmem>>, vector<16x32xf32>
    %c0_16 = arith.constant 0 : index
    %c0_17 = arith.constant 0 : index
    %31 = vector.load %arg3[%c0_16, %c0_17] : memref<16x32xf32, #tpu.memory_space<vmem>>, vector<16x32xf32>
    %32 = tpu.concatenate %24, %30, %31 in 0 : vector<16x32xf32>, vector<16x32xf32>, vector<16x32xf32> -> vector<48x32xf32>
    %c0_18 = arith.constant 0 : index
    %c0_19 = arith.constant 0 : index
    %33 = vector.load %arg8[%c0_18, %c0_19] : memref<32x32xf32, #tpu.memory_space<vmem>>, vector<32x32xf32>
    %cst_20 = arith.constant dense<0.000000e+00> : vector<48x32xf32>
    %34 = tpu.matmul %32, %33, %cst_20 {dimension_numbers = #tpu.dot_dimension_numbers<[1], [0], [0], [1], [0, 0, 1, 1], [], []>} : vector<48x32xf32>, vector<32x32xf32>, vector<48x32xf32> -> vector<48x32xf32>
    %c0_21 = arith.constant 0 : index
    %c0_22 = arith.constant 0 : index
    %35 = vector.load %arg9[%c0_21, %c0_22] : memref<1x32xf32, #tpu.memory_space<vmem>>, vector<1x32xf32>
    %36 = vector.broadcast %35 : vector<1x32xf32> to vector<48x32xf32>
    %37 = arith.addf %34, %36 : vector<48x32xf32>
    %c0_23 = arith.constant 0 : index
    %c0_24 = arith.constant 0 : index
    %38 = vector.load %arg10[%c0_23, %c0_24] : memref<32x32xf32, #tpu.memory_space<vmem>>, vector<32x32xf32>
    %cst_25 = arith.constant dense<0.000000e+00> : vector<48x32xf32>
    %39 = tpu.matmul %32, %38, %cst_25 {dimension_numbers = #tpu.dot_dimension_numbers<[1], [0], [0], [1], [0, 0, 1, 1], [], []>} : vector<48x32xf32>, vector<32x32xf32>, vector<48x32xf32> -> vector<48x32xf32>
    %c0_26 = arith.constant 0 : index
    %c0_27 = arith.constant 0 : index
    %40 = vector.load %arg11[%c0_26, %c0_27] : memref<1x32xf32, #tpu.memory_space<vmem>>, vector<1x32xf32>
    %41 = vector.broadcast %40 : vector<1x32xf32> to vector<48x32xf32>
    %42 = arith.addf %39, %41 : vector<48x32xf32>
    %c0_28 = arith.constant 0 : index
    %c0_29 = arith.constant 0 : index
    %43 = vector.load %arg4[%c0_28, %c0_29] : memref<64x32xf32, #tpu.memory_space<vmem>>, vector<64x32xf32>
    %44 = tpu.concatenate %29, %29, %29, %29 in 0 : vector<16x32xf32>, vector<16x32xf32>, vector<16x32xf32>, vector<16x32xf32> -> vector<64x32xf32>
    %45 = arith.mulf %44, %43 : vector<64x32xf32>
    %cst_30 = arith.constant dense<0.000000e+00> : vector<64x48xf32>
    %46 = tpu.matmul %45, %37, %cst_30 {dimension_numbers = #tpu.dot_dimension_numbers<[1], [1], [0], [0], [0, 0, 1, 0], [], []>} : vector<64x32xf32>, vector<48x32xf32>, vector<64x48xf32> -> vector<64x48xf32>
    %c0_31 = arith.constant 0 : index
    %c0_32 = arith.constant 0 : index
    %c0_33 = arith.constant 0 : index
    %47 = vector.load %arg5[%c0_31, %c0_32, %c0_33] : memref<3x64x48xf32, #tpu.memory_space<vmem>>, vector<1x64x48xf32>
    %48 = vector.shape_cast %47 : vector<1x64x48xf32> to vector<64x48xf32>
    %c1 = arith.constant 1 : index
    %c0_34 = arith.constant 0 : index
    %c0_35 = arith.constant 0 : index
    %49 = vector.load %arg5[%c1, %c0_34, %c0_35] : memref<3x64x48xf32, #tpu.memory_space<vmem>>, vector<1x64x48xf32>
    %50 = vector.shape_cast %49 : vector<1x64x48xf32> to vector<64x48xf32>
    %c2 = arith.constant 2 : index
    %c0_36 = arith.constant 0 : index
    %c0_37 = arith.constant 0 : index
    %51 = vector.load %arg5[%c2, %c0_36, %c0_37] : memref<3x64x48xf32, #tpu.memory_space<vmem>>, vector<1x64x48xf32>
    %52 = vector.shape_cast %51 : vector<1x64x48xf32> to vector<64x48xf32>
    %53 = arith.addf %48, %50 : vector<64x48xf32>
    %54 = arith.addf %53, %52 : vector<64x48xf32>
    %cst_38 = arith.constant 5.000000e-01 : f32
    %55 = vector.broadcast %cst_38 : f32 to vector<64x48xf32>
    %56 = arith.cmpf ogt, %54, %55 : vector<64x48xf32>
    %cst_39 = arith.constant -1.000000e+30 : f32
    %57 = vector.broadcast %cst_39 : f32 to vector<64x48xf32>
    %58 = arith.select %56, %46, %57 : vector<64x48xi1>, vector<64x48xf32>
    %cst_40 = arith.constant dense<0xFF800000> : vector<64xf32>
    %59 = vector.multi_reduction <maximumf>, %58, %cst_40 [1] : vector<64x48xf32> to vector<64xf32>
    %60 = vector.shape_cast %59 : vector<64xf32> to vector<64x1xf32>
    %61 = vector.broadcast %60 : vector<64x1xf32> to vector<64x48xf32>
    %62 = arith.subf %58, %61 : vector<64x48xf32>
    %63 = math.exp %62 : vector<64x48xf32>
    %64 = arith.mulf %63, %48 : vector<64x48xf32>
    %cst_41 = arith.constant dense<0.000000e+00> : vector<64xf32>
    %65 = vector.multi_reduction <add>, %64, %cst_41 [1] : vector<64x48xf32> to vector<64xf32>
    %66 = vector.shape_cast %65 : vector<64xf32> to vector<64x1xf32>
    %67 = arith.mulf %63, %50 : vector<64x48xf32>
    %cst_42 = arith.constant dense<0.000000e+00> : vector<64xf32>
    %68 = vector.multi_reduction <add>, %67, %cst_42 [1] : vector<64x48xf32> to vector<64xf32>
    %69 = vector.shape_cast %68 : vector<64xf32> to vector<64x1xf32>
    %70 = arith.mulf %63, %52 : vector<64x48xf32>
    %cst_43 = arith.constant dense<0.000000e+00> : vector<64xf32>
    %71 = vector.multi_reduction <add>, %70, %cst_43 [1] : vector<64x48xf32> to vector<64xf32>
    %72 = vector.shape_cast %71 : vector<64xf32> to vector<64x1xf32>
    %73 = tpu.reciprocal %66 {approx = true} : vector<64x1xf32> -> vector<64x1xf32>
    %74 = vector.broadcast %73 : vector<64x1xf32> to vector<64x48xf32>
    %75 = arith.mulf %48, %74 : vector<64x48xf32>
    %cst_44 = arith.constant 5.000000e-01 : f32
    %76 = vector.broadcast %cst_44 : f32 to vector<64x48xf32>
    %77 = arith.mulf %76, %50 : vector<64x48xf32>
    %78 = tpu.reciprocal %69 {approx = true} : vector<64x1xf32> -> vector<64x1xf32>
    %79 = vector.broadcast %78 : vector<64x1xf32> to vector<64x48xf32>
    %80 = arith.mulf %77, %79 : vector<64x48xf32>
    %81 = arith.addf %75, %80 : vector<64x48xf32>
    %cst_45 = arith.constant 1.500000e+00 : f32
    %82 = vector.broadcast %cst_45 : f32 to vector<64x48xf32>
    %83 = arith.mulf %82, %52 : vector<64x48xf32>
    %84 = tpu.reciprocal %72 {approx = true} : vector<64x1xf32> -> vector<64x1xf32>
    %85 = vector.broadcast %84 : vector<64x1xf32> to vector<64x48xf32>
    %86 = arith.mulf %83, %85 : vector<64x48xf32>
    %87 = arith.addf %81, %86 : vector<64x48xf32>
    %88 = arith.mulf %63, %87 : vector<64x48xf32>
    %cst_46 = arith.constant dense<0.000000e+00> : vector<64x32xf32>
    %89 = tpu.matmul %88, %42, %cst_46 {dimension_numbers = #tpu.dot_dimension_numbers<[1], [0], [0], [1], [0, 0, 1, 1], [], []>} : vector<64x48xf32>, vector<48x32xf32>, vector<64x32xf32> -> vector<64x32xf32>
    %90 = arith.mulf %89, %43 : vector<64x32xf32>
    %91 = vector.extract_strided_slice %90 {offsets = [0, 0], sizes = [16, 32], strides = [1, 1]} : vector<64x32xf32> to vector<16x32xf32>
    %92 = vector.extract_strided_slice %90 {offsets = [16, 0], sizes = [16, 32], strides = [1, 1]} : vector<64x32xf32> to vector<16x32xf32>
    %93 = arith.addf %91, %92 : vector<16x32xf32>
    %94 = vector.extract_strided_slice %90 {offsets = [32, 0], sizes = [16, 32], strides = [1, 1]} : vector<64x32xf32> to vector<16x32xf32>
    %95 = arith.addf %93, %94 : vector<16x32xf32>
    %96 = vector.extract_strided_slice %90 {offsets = [48, 0], sizes = [16, 32], strides = [1, 1]} : vector<64x32xf32> to vector<16x32xf32>
    %97 = arith.addf %95, %96 : vector<16x32xf32>
    %c0_47 = arith.constant 0 : index
    %c0_48 = arith.constant 0 : index
    %98 = vector.load %arg12[%c0_47, %c0_48] : memref<32x32xf32, #tpu.memory_space<vmem>>, vector<32x32xf32>
    %cst_49 = arith.constant dense<0.000000e+00> : vector<16x32xf32>
    %99 = tpu.matmul %97, %98, %cst_49 {dimension_numbers = #tpu.dot_dimension_numbers<[1], [0], [0], [1], [0, 0, 1, 1], [], []>} : vector<16x32xf32>, vector<32x32xf32>, vector<16x32xf32> -> vector<16x32xf32>
    %c0_50 = arith.constant 0 : index
    %c0_51 = arith.constant 0 : index
    %100 = vector.load %arg13[%c0_50, %c0_51] : memref<1x32xf32, #tpu.memory_space<vmem>>, vector<1x32xf32>
    %101 = vector.broadcast %100 : vector<1x32xf32> to vector<16x32xf32>
    %102 = arith.addf %99, %101 : vector<16x32xf32>
    %103 = arith.addf %24, %102 : vector<16x32xf32>
    %c0_52 = arith.constant 0 : index
    %c0_53 = arith.constant 0 : index
    %104 = vector.load %arg16[%c0_52, %c0_53] : memref<1x32xf32, #tpu.memory_space<vmem>>, vector<1x32xf32>
    %c0_54 = arith.constant 0 : index
    %c0_55 = arith.constant 0 : index
    %105 = vector.load %arg17[%c0_54, %c0_55] : memref<1x32xf32, #tpu.memory_space<vmem>>, vector<1x32xf32>
    %cst_56 = arith.constant dense<0.000000e+00> : vector<16xf32>
    %106 = vector.multi_reduction <add>, %103, %cst_56 [1] : vector<16x32xf32> to vector<16xf32>
    %107 = vector.shape_cast %106 : vector<16xf32> to vector<16x1xf32>
    %cst_57 = arith.constant 3.200000e+01 : f32
    %108 = vector.broadcast %cst_57 : f32 to vector<16x1xf32>
    %109 = arith.divf %107, %108 : vector<16x1xf32>
    %110 = vector.broadcast %109 : vector<16x1xf32> to vector<16x32xf32>
    %111 = arith.subf %103, %110 : vector<16x32xf32>
    %112 = arith.mulf %111, %111 : vector<16x32xf32>
    %cst_58 = arith.constant dense<0.000000e+00> : vector<16xf32>
    %113 = vector.multi_reduction <add>, %112, %cst_58 [1] : vector<16x32xf32> to vector<16xf32>
    %114 = vector.shape_cast %113 : vector<16xf32> to vector<16x1xf32>
    %cst_59 = arith.constant 3.200000e+01 : f32
    %115 = vector.broadcast %cst_59 : f32 to vector<16x1xf32>
    %116 = arith.divf %114, %115 : vector<16x1xf32>
    %117 = vector.broadcast %109 : vector<16x1xf32> to vector<16x32xf32>
    %118 = arith.subf %103, %117 : vector<16x32xf32>
    %cst_60 = arith.constant 9.99999974E-6 : f32
    %119 = vector.broadcast %cst_60 : f32 to vector<16x1xf32>
    %120 = arith.addf %116, %119 : vector<16x1xf32>
    %121 = math.rsqrt %120 : vector<16x1xf32>
    %122 = vector.broadcast %121 : vector<16x1xf32> to vector<16x32xf32>
    %123 = arith.mulf %118, %122 : vector<16x32xf32>
    %124 = vector.broadcast %104 : vector<1x32xf32> to vector<16x32xf32>
    %125 = arith.mulf %123, %124 : vector<16x32xf32>
    %126 = vector.broadcast %105 : vector<1x32xf32> to vector<16x32xf32>
    %127 = arith.addf %125, %126 : vector<16x32xf32>
    %c0_61 = arith.constant 0 : index
    %c0_62 = arith.constant 0 : index
    %128 = vector.load %arg18[%c0_61, %c0_62] : memref<32x64xf32, #tpu.memory_space<vmem>>, vector<32x64xf32>
    %cst_63 = arith.constant dense<0.000000e+00> : vector<16x64xf32>
    %129 = tpu.matmul %127, %128, %cst_63 {dimension_numbers = #tpu.dot_dimension_numbers<[1], [0], [0], [1], [0, 0, 1, 1], [], []>} : vector<16x32xf32>, vector<32x64xf32>, vector<16x64xf32> -> vector<16x64xf32>
    %c0_64 = arith.constant 0 : index
    %c0_65 = arith.constant 0 : index
    %130 = vector.load %arg19[%c0_64, %c0_65] : memref<1x64xf32, #tpu.memory_space<vmem>>, vector<1x64xf32>
    %131 = vector.broadcast %130 : vector<1x64xf32> to vector<16x64xf32>
    %132 = arith.addf %129, %131 : vector<16x64xf32>
    %cst_66 = arith.constant 0.000000e+00 : f32
    %133 = vector.broadcast %cst_66 : f32 to vector<16x64xf32>
    %134 = arith.maximumf %132, %133 : vector<16x64xf32>
    %c0_67 = arith.constant 0 : index
    %c0_68 = arith.constant 0 : index
    %135 = vector.load %arg20[%c0_67, %c0_68] : memref<64x32xf32, #tpu.memory_space<vmem>>, vector<64x32xf32>
    %cst_69 = arith.constant dense<0.000000e+00> : vector<16x32xf32>
    %136 = tpu.matmul %134, %135, %cst_69 {dimension_numbers = #tpu.dot_dimension_numbers<[1], [0], [0], [1], [0, 0, 1, 1], [], []>} : vector<16x64xf32>, vector<64x32xf32>, vector<16x32xf32> -> vector<16x32xf32>
    %c0_70 = arith.constant 0 : index
    %c0_71 = arith.constant 0 : index
    %137 = vector.load %arg21[%c0_70, %c0_71] : memref<1x32xf32, #tpu.memory_space<vmem>>, vector<1x32xf32>
    %138 = vector.broadcast %137 : vector<1x32xf32> to vector<16x32xf32>
    %139 = arith.addf %136, %138 : vector<16x32xf32>
    %140 = arith.addf %127, %139 : vector<16x32xf32>
    %c0_72 = arith.constant 0 : index
    %c0_73 = arith.constant 0 : index
    %141 = vector.load %arg22[%c0_72, %c0_73] : memref<16x32xf32, #tpu.memory_space<vmem>>, vector<16x32xf32>
    tpu.vector_store %arg22[%c0_72, %c0_73], %140 {strides = array<i32>} : memref<16x32xf32, #tpu.memory_space<vmem>>, vector<16x32xf32>,
    return
  }
  func.func @transform_0(%arg0: i32) -> (i32, i32) {
    %c0_i32 = arith.constant 0 : i32
    %c0_i32_0 = arith.constant 0 : i32
    %c0_i32_1 = arith.constant 0 : i32
    return %c0_i32, %c0_i32_0 : i32, i32
  }
  func.func @transform_1(%arg0: i32) -> (i32, i32) {
    %c0_i32 = arith.constant 0 : i32
    %c0_i32_0 = arith.constant 0 : i32
    %c0_i32_1 = arith.constant 0 : i32
    return %c0_i32, %c0_i32_0 : i32, i32
  }
  func.func @transform_2(%arg0: i32) -> (i32, i32) {
    %c0_i32 = arith.constant 0 : i32
    %c0_i32_0 = arith.constant 0 : i32
    %c0_i32_1 = arith.constant 0 : i32
    return %c0_i32, %c0_i32_0 : i32, i32
  }
  func.func @transform_3(%arg0: i32) -> (i32, i32) {
    %c0_i32 = arith.constant 0 : i32
    %c0_i32_0 = arith.constant 0 : i32
    %c0_i32_1 = arith.constant 0 : i32
    return %c0_i32, %c0_i32_0 : i32, i32
  }
  func.func @transform_4(%arg0: i32) -> (i32, i32, i32) {
    %c0_i32 = arith.constant 0 : i32
    %c0_i32_0 = arith.constant 0 : i32
    %c0_i32_1 = arith.constant 0 : i32
    %c0_i32_2 = arith.constant 0 : i32
    return %c0_i32, %c0_i32_0, %c0_i32_1 : i32, i32, i32
  }
  func.func @transform_5(%arg0: i32) -> (i32, i32) {
    %c0_i32 = arith.constant 0 : i32
    %c0_i32_0 = arith.constant 0 : i32
    %c0_i32_1 = arith.constant 0 : i32
    return %c0_i32, %c0_i32_0 : i32, i32
  }
  func.func @transform_6(%arg0: i32) -> (i32, i32) {
    %c0_i32 = arith.constant 0 : i32
    %c0_i32_0 = arith.constant 0 : i32
    %c0_i32_1 = arith.constant 0 : i32
    return %c0_i32, %c0_i32_0 : i32, i32
  }
  func.func @transform_7(%arg0: i32) -> (i32, i32) {
    %c0_i32 = arith.constant 0 : i32
    %c0_i32_0 = arith.constant 0 : i32
    %c0_i32_1 = arith.constant 0 : i32
    return %c0_i32, %c0_i32_0 : i32, i32
  }
  func.func @transform_8(%arg0: i32) -> (i32, i32) {
    %c0_i32 = arith.constant 0 : i32
    %c0_i32_0 = arith.constant 0 : i32
    %c0_i32_1 = arith.constant 0 : i32
    return %c0_i32, %c0_i32_0 : i32, i32
  }
  func.func @transform_9(%arg0: i32) -> (i32, i32) {
    %c0_i32 = arith.constant 0 : i32
    %c0_i32_0 = arith.constant 0 : i32
    %c0_i32_1 = arith.constant 0 : i32
    return %c0_i32, %c0_i32_0 : i32, i32
  }
  func.func @transform_10(%arg0: i32) -> (i32, i32) {
    %c0_i32 = arith.constant 0 : i32
    %c0_i32_0 = arith.constant 0 : i32
    %c0_i32_1 = arith.constant 0 : i32
    return %c0_i32, %c0_i32_0 : i32, i32
  }
  func.func @transform_11(%arg0: i32) -> (i32, i32) {
    %c0_i32 = arith.constant 0 : i32
    %c0_i32_0 = arith.constant 0 : i32
    %c0_i32_1 = arith.constant 0 : i32
    return %c0_i32, %c0_i32_0 : i32, i32
  }
  func.func @transform_12(%arg0: i32) -> (i32, i32) {
    %c0_i32 = arith.constant 0 : i32
    %c0_i32_0 = arith.constant 0 : i32
    %c0_i32_1 = arith.constant 0 : i32
    return %c0_i32, %c0_i32_0 : i32, i32
  }
  func.func @transform_13(%arg0: i32) -> (i32, i32) {
    %c0_i32 = arith.constant 0 : i32
    %c0_i32_0 = arith.constant 0 : i32
    %c0_i32_1 = arith.constant 0 : i32
    return %c0_i32, %c0_i32_0 : i32, i32
  }
  func.func @transform_14(%arg0: i32) -> (i32, i32) {
    %c0_i32 = arith.constant 0 : i32
    %c0_i32_0 = arith.constant 0 : i32
    %c0_i32_1 = arith.constant 0 : i32
    return %c0_i32, %c0_i32_0 : i32, i32
  }
  func.func @transform_15(%arg0: i32) -> (i32, i32) {
    %c0_i32 = arith.constant 0 : i32
    %c0_i32_0 = arith.constant 0 : i32
    %c0_i32_1 = arith.constant 0 : i32
    return %c0_i32, %c0_i32_0 : i32, i32
  }
  func.func @transform_16(%arg0: i32) -> (i32, i32) {
    %c0_i32 = arith.constant 0 : i32
    %c0_i32_0 = arith.constant 0 : i32
    %c0_i32_1 = arith.constant 0 : i32
    return %c0_i32, %c0_i32_0 : i32, i32
  }
  func.func @transform_17(%arg0: i32) -> (i32, i32) {
    %c0_i32 = arith.constant 0 : i32
    %c0_i32_0 = arith.constant 0 : i32
    %c0_i32_1 = arith.constant 0 : i32
    return %c0_i32, %c0_i32_0 : i32, i32
  }
  func.func @transform_18(%arg0: i32) -> (i32, i32) {
    %c0_i32 = arith.constant 0 : i32
    %c0_i32_0 = arith.constant 0 : i32
    %c0_i32_1 = arith.constant 0 : i32
    return %c0_i32, %c0_i32_0 : i32, i32
  }
  func.func @transform_19(%arg0: i32) -> (i32, i32) {
    %c0_i32 = arith.constant 0 : i32
    %c0_i32_0 = arith.constant 0 : i32
    %c0_i32_1 = arith.constant 0 : i32
    return %c0_i32, %c0_i32_0 : i32, i32
  }
  func.func @transform_20(%arg0: i32) -> (i32, i32) {
    %c0_i32 = arith.constant 0 : i32
    %c0_i32_0 = arith.constant 0 : i32
    %c0_i32_1 = arith.constant 0 : i32
    return %c0_i32, %c0_i32_0 : i32, i32
  }
  func.func @transform_21(%arg0: i32) -> (i32, i32) {
    %c0_i32 = arith.constant 0 : i32
    %c0_i32_0 = arith.constant 0 : i32
    %c0_i32_1 = arith.constant 0 : i32
    return %c0_i32, %c0_i32_0 : i32, i32
  }
}

</mosaic_0001>

<bundles_post_ra>
// kernel: tpu_custom_call.1
= control target key start
LH: loop header
LB: loop body
LE: loop exit
PB: predicated region body
PF: predicated region fallthrough
CT: control target
= control target key end

     0   :  { %s1799_s0 = inlined_call_operand.vmem [shape: f32[16,32], index: 0, kind: input, shape index: {}]   ;;  %s1800_s1 = inlined_call_operand.vmem [shape: f32[16,32], index: 1, kind: input, shape index: {}]   ;;  %s1801_s2 = inlined_call_operand.vmem [shape: f32[16,32], index: 2, kind: input, shape index: {}]   ;;  %s1802_s3 = inlined_call_operand.vmem [shape: f32[64,32], index: 3, kind: input, shape index: {}]   ;;  %s1803_s4 = inlined_call_operand.vmem [shape: f32[3,64,48], index: 4, kind: input, shape index: {}]   ;;  %s1804_s5 = inlined_call_operand.vmem [shape: f32[32,32], index: 5, kind: input, shape index: {}]   ;;  %s1805_s6 = inlined_call_operand.vmem [shape: f32[1,32], index: 6, kind: input, shape index: {}]   ;;  %s1806_s7 = inlined_call_operand.vmem [shape: f32[32,32], index: 7, kind: input, shape index: {}]   ;;  %s1807_s8 = inlined_call_operand.vmem [shape: f32[1,32], index: 8, kind: input, shape index: {}]   ;;  %s1808_s9 = inlined_call_operand.vmem [shape: f32[32,32], index: 9, kind: input, shape index: {}]   ;;  %s1809_s10 = inlined_call_operand.vmem [shape: f32[1,32], index: 10, kind: input, shape index: {}]   ;;  %s1810_s11 = inlined_call_operand.vmem [shape: f32[32,32], index: 11, kind: input, shape index: {}]   ;;  %s1811_s12 = inlined_call_operand.vmem [shape: f32[1,32], index: 12, kind: input, shape index: {}]   ;;  %s1812_s13 = inlined_call_operand.vmem [shape: f32[1,32], index: 13, kind: input, shape index: {}]   ;;  %s1813_s14 = inlined_call_operand.vmem [shape: f32[1,32], index: 14, kind: input, shape index: {}]   ;;  %s1814_s15 = inlined_call_operand.vmem [shape: f32[1,32], index: 15, kind: input, shape index: {}]   ;;  %s1815_s16 = inlined_call_operand.vmem [shape: f32[1,32], index: 16, kind: input, shape index: {}]   ;;  %s1816_s17 = inlined_call_operand.vmem [shape: f32[32,64], index: 17, kind: input, shape index: {}]   ;;  %s1817_s18 = inlined_call_operand.vmem [shape: f32[1,64], index: 18, kind: input, shape index: {}]   ;;  %s1818_s19 = inlined_call_operand.vmem [shape: f32[64,32], index: 19, kind: input, shape index: {}]   ;;  %s1819_s20 = inlined_call_operand.vmem [shape: f32[1,32], index: 20, kind: input, shape index: {}]   ;;  %s1820_s21 = inlined_call_operand.hbm [shape: f32[16,32], index: 21, kind: output, shape index: {}]  }
   0x1   :  { %1827 = sst [smem:[#allocation5_spill]] %s1799_s0 }
   0x2   :  { %1828 = sst [smem:[#allocation6_spill]] %s1800_s1 }
   0x3   :  { %1829 = sst [smem:[#allocation7_spill]] %s1801_s2 }
   0x4   :  { %1830 = sst [smem:[#allocation8_spill]] %s1802_s3 }
   0x5   :  { %1831 = sst [smem:[#allocation9_spill]] %s1803_s4 }
   0x6   :  { %1832 = sst [smem:[#allocation10_spill]] %s1804_s5 }
   0x7   :  { %s1833_s26 = sld [smem:[#allocation5_spill]]  ;;  %vm73_vm0 = vcmask 261120  }
   0xd   :  { %v69_v0 = vld [vmem:[%s1833_s26] sm:$0xff]  ;;  %v70_v2 = vld [vmem:[%s1833_s26 + $0x8] sm:$0xff] }
   0xe   :  { %v74_v1 = vsel %vm73_vm0, %v69_v0, 0.0 }
   0xf   :  { %75 = vadd.xlane.f32.xlu0 %v74_v1 }
  0x10   :  { %26 = vsyncpa [#allocation3], 0  ;;  %v77_v3 = vsel %vm73_vm0, %v70_v2, 0.0  ;;  %v1113_v4 = vmov 32.0   ;;  %s1834_s0 = sld [smem:[#allocation10_spill]]  ;;  %v179_v22 = vld [vmem:[%s1806_s7 + $0x18] sm:$0xff] }
  0x11   :  { %1013 = vrcp.f32 %v1113_v4  ;;  %v234_v23 = vld [vmem:[%s1808_s9 + $0x18] sm:$0xff]  ;;  %208 = vmatpush.msra.mxu1 %v179_v22  ;;  %v178_v25 = vld [vmem:[%s1806_s7 + $0x10] sm:$0xff]  ;;  %v177_v28 = vld [vmem:[%s1806_s7 + $0x8] sm:$0xff]  ;;  %s1835_s26 = sld [smem:[#allocation6_spill]]  ;;  %vm431_vm9 = vcmask 392192   ;;  %s929_s22 = sshll.u32 %s1820_s21, 4  ;;  %s930_s22 = int_to_ptr.hbm [resolvable:$true] %s929_s22 }
  0x12   :  { %251 = vmatpush.msra.mxu2 %v234_v23  ;;  %v233_v26 = vld [vmem:[%s1808_s9 + $0x10] sm:$0xff]  ;;  %v232_v29 = vld [vmem:[%s1808_s9 + $0x8] sm:$0xff]  ;;  %v176_v31 = vld [vmem:[%s1806_s7] sm:$0xff]  ;;  %s1836_s4 = sld [smem:[#allocation7_spill]]  ;;  %s1115_s23 = smov 128  }
  0x13   :  { %209 = vmatpush.msra.mxu1 %v178_v25  ;;  %v231_v32 = vld [vmem:[%s1808_s9] sm:$0xff]  ;;  %s1837_s9 = sld [smem:[#allocation8_spill]] }
  0x14   :  { %252 = vmatpush.msra.mxu2 %v233_v26  ;;  %v1003_v47 = vld [vmem:[%s1812_s13] ss:$0 sm:$0xff]  ;;  %s1838_s24 = sld [smem:[#allocation9_spill]] }
  0x15   :  { %210 = vmatpush.msra.mxu1 %v177_v28  ;;  %v1004_v51 = vld [vmem:[%s1813_s14] ss:$0 sm:$0xff] }
  0x16   :  { %v138_v21 = vld [vmem:[%s1834_s0 + $0x18] sm:$0xff]  ;;  %v137_v24 = vld [vmem:[%s1834_s0 + $0x10] sm:$0xff]  ;;  %v136_v27 = vld [vmem:[%s1834_s0 + $0x8] sm:$0xff]  ;;  %253 = vmatpush.msra.mxu2 %v232_v29 }
  0x17   :  { %78 = vadd.xlane.f32.xlu0 %v77_v3  ;;  %v1014_v5 = vpop.eup %1013  ;;  %161 = vmatpush.msra.mxu0 %v138_v21  ;;  %v135_v30 = vld [vmem:[%s1834_s0] sm:$0xff]  ;;  %v173_v62 = vld [vmem:[%s1835_s26 + $0x8] sm:$0xff] }
  0x18   :  { %v81_v6 = vmul.f32 32.0, %v1014_v5  ;;  %vm85_vm1 = vweird.f32 %v1014_v5  ;;  %211 = vmatpush.msra.mxu1 %v176_v31  ;;  %254 = vmatpush.msra.mxu2 %v231_v32  ;;  %v172_v61 = vld [vmem:[%s1835_s26] sm:$0xff] }
  0x19   :  { %162 = vmatpush.msra.mxu0 %v137_v24  ;;  %v174_v63 = vld [vmem:[%s1836_s4] sm:$0xff] }
  0x1a   :  { %v82_v7 = vsub.f32 1.0, %v81_v6  ;;  %v1005_v25 = vld [vmem:[%s1805_s6] ss:$0 sm:$0xff] }
  0x1b   :  { %163 = vmatpush.msra.mxu0 %v136_v27  ;;  %v1343_v31 = vld [vmem:[%s1837_s9] sm:$0xff] }
  0x1c   :  { %v83_v8 = vmul.f32 %v1014_v5, %v82_v7 }
  0x1d   :  { %164 = vmatpush.msra.mxu0 %v135_v30 }
  0x1e   :  { %v84_v9 = vadd.f32 %v1014_v5, %v83_v8 }
  0x20   :  { %v1235_v10 = vsel %vm85_vm1, %v1014_v5, %v84_v9 }
  0x82   :  { %v76_v11 = vpop.xlane.xlu0 %75 }
  0x83   :  { %v87_v12 = vmul.f32 %v1235_v10, %v76_v11  ;;  %v1006_v11 = vld [vmem:[%s1807_s8] ss:$0 sm:$0xff] }
  0x85   :  { %v89_v13 = vsub.f32 %v69_v0, %v87_v12  ;;  %v175_v0 = vld [vmem:[%s1836_s4 + $0x8] sm:$0xff] }
  0x87   :  { %v91_v14 = vmul.f32 %v89_v13, %v89_v13 }
  0x89   :  { %v93_v15 = vsel %vm73_vm0, %v91_v14, 0.0 }
  0x8a   :  { %94 = vadd.xlane.f32.xlu1 %v93_v15  ;;  %v79_v16 = vpop.xlane.xlu0 %78 }
  0x8b   :  { %v88_v17 = vmul.f32 %v1235_v10, %v79_v16  ;;  %v1007_v16 = vld [vmem:[%s1809_s10] ss:$0 sm:$0xff] }
  0x8d   :  { %v1240_v18 = vsub.f32 %v70_v2, %v88_v17 }
  0x8f   :  { %v92_v19 = vmul.f32 %v1240_v18, %v1240_v18 }
  0x91   :  { %v96_v20 = vsel %vm73_vm0, %v92_v19, 0.0 }
  0x92   :  { %97 = vadd.xlane.f32.xlu1 %v96_v20 }
  0xfd   :  { %v95_v33 = vpop.xlane.xlu1 %94 }
  0xfe   :  { %v99_v34 = vmul.f32 %v95_v33, %v1235_v10 }
 0x100   :  { %v101_v35 = vadd.f32 1e-05, %v99_v34 }
 0x102   :  { %1015 = vrsqrt.f32 %v101_v35  ;;  %vm109_vm3 = vweird.f32 %v101_v35 }
 0x105   :  { %v98_v36 = vpop.xlane.xlu1 %97 }
 0x106   :  { %v100_v37 = vmul.f32 %v98_v36, %v1235_v10 }
 0x108   :  { %v1016_v38 = vpop.eup %1015  ;;  %v102_v39 = vadd.f32 1e-05, %v100_v37  ;;  %v1358_v37 = vld [vmem:[%s1837_s9 + $0x10] sm:$0xff] }
 0x109   :  { %v104_v40 = vmul.f32 %v1016_v38, %v101_v35  ;;  %vm110_vm2 = vweird.f32 %v1016_v38  ;;  %v1351_v35 = vld [vmem:[%s1837_s9 + $0x8] sm:$0xff] }
 0x10a   :  { %1017 = vrsqrt.f32 %v102_v39  ;;  %vm111_vm4 = vmor %vm109_vm3, %vm110_vm2  ;;  %vm119_vm6 = vweird.f32 %v102_v39 }
 0x10b   :  { %v105_v41 = vmul.f32 %v1016_v38, %v104_v40 }
 0x10d   :  { %v106_v42 = vmul.f32 0.5, %v105_v41  ;;  %v1372_v41 = vld [vmem:[%s1837_s9 + $0x20] sm:$0xff] }
 0x10f   :  { %v107_v43 = vsub.f32 1.5, %v106_v42 }
 0x110   :  { %v1018_v44 = vpop.eup %1017 }
 0x111   :  { %v108_v45 = vmul.f32 %v1016_v38, %v107_v43  ;;  %v114_v46 = vmul.f32 %v1018_v44, %v102_v39  ;;  %vm120_vm5 = vweird.f32 %v1018_v44  ;;  %v1365_v39 = vld [vmem:[%s1837_s9 + $0x18] sm:$0xff]  ;;  %v1379_v43 = vld [vmem:[%s1837_s9 + $0x28] sm:$0xff] }
 0x112   :  { %vm121_vm7 = vmor %vm119_vm6, %vm120_vm5 }
 0x113   :  { %v112_v48 = vsel %vm111_vm4, %v1016_v38, %v108_v45  ;;  %v115_v49 = vmul.f32 %v1018_v44, %v114_v46  ;;  %v1386_v45 = vld [vmem:[%s1837_s9 + $0x30] sm:$0xff] }
 0x114   :  { %v123_v50 = vmul.f32 %v112_v48, %v89_v13 }
 0x115   :  { %v116_v52 = vmul.f32 0.5, %v115_v49  ;;  %v1400_v49 = vld [vmem:[%s1838_s24] sm:$0xff] }
 0x116   :  { %v128_v53 = vmul.f32 %v1003_v47, %v123_v50  ;;  %v1405_v50 = vld [vmem:[%s1838_s24 + $0x40] sm:$0xff] }
 0x117   :  { %v117_v54 = vsub.f32 1.5, %v116_v52  ;;  %v1412_v52 = vld [vmem:[%s1838_s24 + $0x80] sm:$0xff] }
 0x118   :  { %v1289_v55 = vadd.f32 %v1004_v51, %v128_v53 }
 0x119   :  { %v118_v56 = vmul.f32 %v1018_v44, %v117_v54  ;;  %v1418_v54 = vld [vmem:[%s1838_s24 + $0x8] sm:$0xff] }
 0x11a   :  { %941 = vmatmul.msk.f32.vlgmr.msra.gmra.mxu0 %vm73_vm0, %v1289_v55  ;;  %943 = vmatmul.msk.f32.vlgmr.msra.gmra.mxu1 %vm73_vm0, %v1289_v55 }
 0x11b   :  { %v122_v57 = vsel %vm121_vm7, %v1018_v44, %v118_v56  ;;  %949 = vmatmul.msk.f32.vlgmr.msra.gmra.mxu2 %vm73_vm0, %v1289_v55  ;;  %v1423_v56 = vld [vmem:[%s1838_s24 + $0x48] sm:$0xff] }
 0x11c   :  { %v124_v58 = vmul.f32 %v122_v57, %v1240_v18  ;;  %v400_v57 = vadd.f32 %v1423_v56, %v1418_v54 }
 0x11e   :  { %v129_v59 = vmul.f32 %v1003_v47, %v124_v58  ;;  %v1393_v47 = vld [vmem:[%s1837_s9 + $0x38] sm:$0xff]  ;;  %v1430_v58 = vld [vmem:[%s1838_s24 + $0x88] sm:$0xff] }
 0x120   :  { %v1298_v60 = vadd.f32 %v1004_v51, %v129_v59  ;;  %v399_v51 = vadd.f32 %v1405_v50, %v1400_v49 }
 0x122   :  { %942 = vmatmul.msk.f32.gmra.mxu0 %vm73_vm0, %v1298_v60  ;;  %944 = vmatmul.msk.f32.gmra.mxu1 %vm73_vm0, %v1298_v60  ;;  %v407_v53 = vadd.f32 %v1412_v52, %v399_v51  ;;  %v1550_v51 = vld [vmem:[%s1838_s24 + $0x38] sm:$0xff] }
 0x123   :  { %950 = vmatmul.msk.f32.gmra.mxu2 %vm73_vm0, %v1298_v60 }
 0x124   :  { %vm415_vm8 = vcmp.gt.f32.partialorder %v407_v53, 0.5  ;;  %v1555_v53 = vld [vmem:[%s1838_s24 + $0x78] sm:$0xff] }
 0x12a   :  { %945 = vmatmul.msk.f32.gmra.mxu1 %vm73_vm0, %v172_v61 }
 0x12b   :  { %951 = vmatmul.msk.f32.gmra.mxu2 %vm73_vm0, %v172_v61 }
 0x132   :  { %946 = vmatmul.msk.f32.gmra.mxu1 %vm73_vm0, %v173_v62 }
 0x133   :  { %952 = vmatmul.msk.f32.gmra.mxu2 %vm73_vm0, %v173_v62 }
 0x13a   :  { %947 = vmatmul.msk.f32.gmra.mxu1 %vm73_vm0, %v174_v63 }
 0x13b   :  { %953 = vmatmul.msk.f32.gmra.mxu2 %vm73_vm0, %v174_v63  ;;  %v408_v63 = vadd.f32 %v1430_v58, %v400_v57  ;;  %v406_v57 = vadd.f32 %v1555_v53, %v1550_v51 }
 0x13d   :  { %vm416_vm10 = vcmp.gt.f32.partialorder %v408_v63, 0.5 }
 0x142   :  { %948 = vmatmul.msk.f32.gmra.mxu1 %vm73_vm0, %v175_v0 }
 0x143   :  { %954 = vmatmul.msk.f32.gmra.mxu2 %vm73_vm0, %v175_v0  ;;  %v1440_v0 = vld [vmem:[%s1838_s24 + $0x10] sm:$0xff] }
 0x197   :  { %v213_v1 = vpop.f32.mrf.mxu1  ;;  %v166_v24 = vpop.f32.mrf.mxu0 }
 0x198   :  { %v167_v29 = vadd.f32 %v1005_v25, %v166_v24  ;;  %v214_v30 = vadd.f32 %v1006_v11, %v213_v1  ;;  %v1445_v1 = vld [vmem:[%s1838_s24 + $0x50] sm:$0xff] }
 0x19a   :  { %v282_v32 = vmul.f32 %v1343_v31, %v167_v29  ;;  %v284_v38 = vmul.f32 %v1358_v37, %v167_v29  ;;  %v286_v42 = vmul.f32 %v1372_v41, %v167_v29  ;;  %v288_v46 = vmul.f32 %v1386_v45, %v167_v29 }
 0x19e   :  { %v256_v2 = vpop.f32.mrf.mxu2 }
 0x19f   :  { %v216_v3 = vpop.f32.mrf.mxu1  ;;  %v257_v28 = vadd.f32 %v1007_v16, %v256_v2  ;;  %v169_v33 = vpop.f32.mrf.mxu0  ;;  %v401_v2 = vadd.f32 %v1445_v1, %v1440_v0 }
 0x1a0   :  { %v217_v27 = vadd.f32 %v1006_v11, %v216_v3  ;;  %v170_v34 = vadd.f32 %v1005_v25, %v169_v33  ;;  %v1452_v3 = vld [vmem:[%s1838_s24 + $0x90] sm:$0xff]  ;;  %v1506_v25 = vld [vmem:[%s1838_s24 + $0x28] sm:$0xff] }
 0x1a2   :  { %v283_v36 = vmul.f32 %v1351_v35, %v170_v34  ;;  %v285_v40 = vmul.f32 %v1365_v39, %v170_v34  ;;  %v287_v44 = vmul.f32 %v1379_v43, %v170_v34  ;;  %v289_v48 = vmul.f32 %v1393_v47, %v170_v34  ;;  %v1528_v34 = vld [vmem:[%s1838_s24 + $0x30] sm:$0xff] }
 0x1a6   :  { %v259_v4 = vpop.f32.mrf.mxu2 }
 0x1a7   :  { %v219_v5 = vpop.f32.mrf.mxu1  ;;  %v260_v26 = vadd.f32 %v1007_v16, %v259_v4 }
 0x1a8   :  { %v220_v23 = vadd.f32 %v1006_v11, %v219_v5 }
 0x1ae   :  { %v262_v6 = vpop.f32.mrf.mxu2 }
 0x1af   :  { %v222_v7 = vpop.f32.mrf.mxu1  ;;  %v263_v22 = vadd.f32 %v1007_v16, %v262_v6 }
 0x1b0   :  { %v223_v20 = vadd.f32 %v1006_v11, %v222_v7  ;;  %v409_v7 = vadd.f32 %v1452_v3, %v401_v2 }
 0x1b2   :  { %vm417_vm11 = vcmp.gt.f32.partialorder %v409_v7, 0.5 }
 0x1b6   :  { %v265_v8 = vpop.f32.mrf.mxu2 }
 0x1b7   :  { %v225_v9 = vpop.f32.mrf.mxu1  ;;  %v266_v21 = vadd.f32 %v1007_v16, %v265_v8  ;;  %v1462_v8 = vld [vmem:[%s1838_s24 + $0x18] sm:$0xff] }
 0x1b8   :  { %v226_v15 = vadd.f32 %v1006_v11, %v225_v9  ;;  %v1467_v9 = vld [vmem:[%s1838_s24 + $0x58] sm:$0xff] }
 0x1be   :  { %v268_v12 = vpop.f32.mrf.mxu2 }
 0x1bf   :  { %v228_v13 = vpop.f32.mrf.mxu1  ;;  %v269_v18 = vadd.f32 %v1007_v16, %v268_v12  ;;  %v1474_v12 = vld [vmem:[%s1838_s24 + $0x98] sm:$0xff] }
 0x1c0   :  { %v229_v14 = vadd.f32 %v1006_v11, %v228_v13  ;;  %v402_v11 = vadd.f32 %v1467_v9, %v1462_v8 }
 0x1c2   :  { %955 = vmatpush.xpose.msk.msra.mxu3 %vm73_vm0, %v229_v14 }
 0x1c6   :  { %v271_v17 = vpop.f32.mrf.mxu2  ;;  %956 = vmatpush.xpose.msk.msra.mxu3 %vm73_vm0, %v226_v15 }
 0x1c7   :  { %v272_v19 = vadd.f32 %v1007_v16, %v271_v17  ;;  %v410_v16 = vadd.f32 %v1474_v12, %v402_v11  ;;  %v1484_v17 = vld [vmem:[%s1838_s24 + $0x20] sm:$0xff] }
 0x1c9   :  { %698 = vmatpush.msrb.mxu0 %v272_v19  ;;  %vm418_vm12 = vcmp.gt.f32.partialorder %v410_v16, 0.5 }
 0x1ca   :  { %957 = vmatpush.xpose.msk.msra.mxu3 %vm73_vm0, %v223_v20  ;;  %v1496_v20 = vld [vmem:[%s1838_s24 + $0xa0] sm:$0xff] }
 0x1cb   :  { %699 = vmatpush.msrb.mxu0 %v269_v18  ;;  %v1489_v18 = vld [vmem:[%s1838_s24 + $0x60] sm:$0xff] }
 0x1cc   :  { %v403_v19 = vadd.f32 %v1489_v18, %v1484_v17 }
 0x1cd   :  { %700 = vmatpush.msrb.mxu0 %v266_v21 }
 0x1ce   :  { %958 = vmatpush.xpose.msk.msra.mxu3 %vm73_vm0, %v220_v23  ;;  %v411_v24 = vadd.f32 %v1496_v20, %v403_v19 }
 0x1cf   :  { %701 = vmatpush.msrb.mxu0 %v263_v22 }
 0x1d0   :  { %vm419_vm13 = vcmp.gt.f32.partialorder %v411_v24, 0.5 }
 0x1d1   :  { %702 = vmatpush.msrb.mxu0 %v260_v26  ;;  %v1511_v26 = vld [vmem:[%s1838_s24 + $0x68] sm:$0xff] }
 0x1d2   :  { %959 = vmatpush.xpose.msk.msra.mxu3 %vm73_vm0, %v217_v27  ;;  %v404_v27 = vadd.f32 %v1511_v26, %v1506_v25 }
 0x1d3   :  { %703 = vmatpush.msrb.mxu0 %v257_v28  ;;  %v1518_v28 = vld [vmem:[%s1838_s24 + $0xa8] sm:$0xff] }
 0x1d4   :  { %v412_v33 = vadd.f32 %v1518_v28, %v404_v27 }
 0x1d6   :  { %960 = vmatpush.xpose.msk.msra.mxu3 %vm73_vm0, %v214_v30  ;;  %vm420_vm14 = vcmp.gt.f32.partialorder %v412_v33, 0.5 }
 0x1d9   :  { %961 = vmatmul.msk.f32.vlgmr.msra.gmra.mxu3 %vm73_vm0, %v282_v32 }
 0x1e1   :  { %962 = vmatmul.msk.f32.gmra.mxu3 %vm73_vm0, %v283_v36  ;;  %v1533_v36 = vld [vmem:[%s1838_s24 + $0x70] sm:$0xff] }
 0x1e9   :  { %963 = vmatmul.msk.f32.gmra.mxu3 %vm73_vm0, %v284_v38  ;;  %v405_v38 = vadd.f32 %v1533_v36, %v1528_v34 }
 0x1f1   :  { %964 = vmatmul.msk.f32.gmra.mxu3 %vm73_vm0, %v285_v40  ;;  %v1540_v40 = vld [vmem:[%s1838_s24 + $0xb0] sm:$0xff] }
 0x1f9   :  { %965 = vmatmul.msk.f32.gmra.mxu3 %vm73_vm0, %v286_v42 }
 0x201   :  { %966 = vmatmul.msk.f32.gmra.mxu3 %vm73_vm0, %v287_v44 }
 0x209   :  { %967 = vmatmul.msk.f32.gmra.mxu3 %vm73_vm0, %v288_v46 }
 0x211   :  { %968 = vmatmul.msk.f32.gmra.mxu3 %vm73_vm0, %v289_v48  ;;  %v413_v48 = vadd.f32 %v1540_v40, %v405_v38 }
 0x213   :  { %vm421_vm15 = vcmp.gt.f32.partialorder %v413_v48, 0.5 }
 0x25c   :  { %v349_v59 = vpop.f32.mrf.mxu3 }
 0x25d   :  { %v1432_v61 = vsel %vm415_vm8, %v349_v59, -1e+30  ;;  %v1562_v59 = vld [vmem:[%s1838_s24 + $0xb8] sm:$0xff]  ;;  %vm889_vm8 = vcmask 523264  }
 0x25e   :  { %v432_v62 = vsel %vm431_vm9, %v1432_v61, -inf }
 0x25f   :  { %433 = vmax.xlane.f32.xlu2 %v432_v62 }
 0x264   :  { %v352_v4 = vpop.f32.mrf.mxu3 }
 0x265   :  { %v1454_v5 = vsel %vm416_vm10, %v352_v4, -1e+30  ;;  %v414_v4 = vadd.f32 %v1562_v59, %v406_v57 }
 0x266   :  { %v435_v6 = vsel %vm431_vm9, %v1454_v5, -inf }
 0x267   :  { %436 = vmax.xlane.f32.xlu2 %v435_v6  ;;  %vm422_vm1 = vcmp.gt.f32.partialorder %v414_v4, 0.5 }
 0x26c   :  { %v355_v13 = vpop.f32.mrf.mxu3 }
 0x26d   :  { %v1476_v14 = vsel %vm417_vm11, %v355_v13, -1e+30 }
 0x26e   :  { %v438_v15 = vsel %vm431_vm9, %v1476_v14, -inf }
 0x26f   :  { %439 = vmax.xlane.f32.xlu0 %v438_v15 }
 0x274   :  { %v358_v21 = vpop.f32.mrf.mxu3 }
 0x275   :  { %v1498_v22 = vsel %vm418_vm12, %v358_v21, -1e+30 }
 0x276   :  { %v441_v23 = vsel %vm431_vm9, %v1498_v22, -inf }
 0x277   :  { %442 = vmax.xlane.f32.xlu1 %v441_v23 }
 0x27c   :  { %v361_v29 = vpop.f32.mrf.mxu3 }
 0x27d   :  { %v1520_v30 = vsel %vm419_vm13, %v361_v29, -1e+30 }
 0x27e   :  { %v444_v32 = vsel %vm431_vm9, %v1520_v30, -inf }
 0x27f   :  { %445 = vmax.xlane.f32.xlu2 %v444_v32 }
 0x284   :  { %v364_v42 = vpop.f32.mrf.mxu3 }
 0x285   :  { %v1542_v44 = vsel %vm420_vm14, %v364_v42, -1e+30 }
 0x286   :  { %v447_v46 = vsel %vm431_vm9, %v1542_v44, -inf }
 0x287   :  { %448 = vmax.xlane.f32.xlu0 %v447_v46 }
 0x28c   :  { %v367_v62 = vpop.f32.mrf.mxu3 }
 0x28d   :  { %v1564_v63 = vsel %vm421_vm15, %v367_v62, -1e+30 }
 0x28e   :  { %v450_v2 = vsel %vm431_vm9, %v1564_v63, -inf }
 0x28f   :  { %451 = vmax.xlane.f32.xlu1 %v450_v2 }
 0x294   :  { %v370_v6 = vpop.f32.mrf.mxu3 }
 0x295   :  { %v1569_v7 = vsel %vm422_vm1, %v370_v6, -1e+30 }
 0x296   :  { %v453_v11 = vsel %vm431_vm9, %v1569_v7, -inf }
 0x297   :  { %454 = vmax.xlane.f32.xlu1 %v453_v11 }
 0x2d2   :  { %v434_v13 = vpop.xlane.xlu2 %433 }
 0x2d3   :  { %v456_v15 = vsub.f32 %v1432_v61, %v434_v13 }
 0x2d5   :  { %v464_v16 = vmul.f32 1.442695, %v456_v15 }
 0x2d7   :  { %1019 = vpow2.f32 %v464_v16 }
 0x2da   :  { %v437_v19 = vpop.xlane.xlu2 %436 }
 0x2db   :  { %v457_v21 = vsub.f32 %v1454_v5, %v437_v19 }
 0x2dd   :  { %v1575_v23 = vpop.eup %1019  ;;  %v466_v24 = vmul.f32 1.442695, %v457_v21 }
 0x2de   :  { %v480_v27 = vmul.f32 %v1575_v23, %v1400_v49  ;;  %v512_v29 = vmul.f32 %v1575_v23, %v1405_v50  ;;  %v544_v5 = vmul.f32 %v1575_v23, %v1412_v52 }
 0x2df   :  { %1021 = vpow2.f32 %v466_v24 }
 0x2e0   :  { %v488_v32 = vsel %vm431_vm9, %v480_v27, 0.0  ;;  %v520_v33 = vsel %vm431_vm9, %v512_v29, 0.0  ;;  %v552_v62 = vsel %vm431_vm9, %v544_v5, 0.0 }
 0x2e1   :  { %489 = vadd.xlane.f32.xlu2 %v488_v32  ;;  %521 = vadd.xlane.f32.xlu0 %v520_v33 }
 0x2e2   :  { %v440_v61 = vpop.xlane.xlu0 %439 }
 0x2e3   :  { %v458_v38 = vsub.f32 %v1476_v14, %v440_v61 }
 0x2e5   :  { %v1586_v42 = vpop.eup %1021  ;;  %v468_v46 = vmul.f32 1.442695, %v458_v38 }
 0x2e6   :  { %v481_v48 = vmul.f32 %v1586_v42, %v1418_v54  ;;  %v513_v57 = vmul.f32 %v1586_v42, %v1423_v56  ;;  %v545_v11 = vmul.f32 %v1586_v42, %v1430_v58 }
 0x2e7   :  { %1023 = vpow2.f32 %v468_v46 }
 0x2e8   :  { %v491_v2 = vsel %vm431_vm9, %v481_v48, 0.0  ;;  %v523_v4 = vsel %vm431_vm9, %v513_v57, 0.0  ;;  %v555_v21 = vsel %vm431_vm9, %v545_v11, 0.0 }
 0x2e9   :  { %553 = vadd.xlane.f32.xlu2 %v552_v62  ;;  %492 = vadd.xlane.f32.xlu0 %v491_v2 }
 0x2ea   :  { %524 = vadd.xlane.f32.xlu1 %v523_v4  ;;  %v443_v14 = vpop.xlane.xlu1 %442 }
 0x2eb   :  { %v459_v6 = vsub.f32 %v1498_v22, %v443_v14 }
 0x2ed   :  { %v1598_v13 = vpop.eup %1023  ;;  %v470_v15 = vmul.f32 1.442695, %v459_v6 }
 0x2ee   :  { %v482_v16 = vmul.f32 %v1598_v13, %v1440_v0  ;;  %v514_v19 = vmul.f32 %v1598_v13, %v1445_v1  ;;  %v546_v32 = vmul.f32 %v1598_v13, %v1452_v3 }
 0x2ef   :  { %1025 = vpow2.f32 %v470_v15 }
 0x2f0   :  { %v494_v24 = vsel %vm431_vm9, %v482_v16, 0.0  ;;  %v526_v27 = vsel %vm431_vm9, %v514_v19, 0.0  ;;  %v558_v46 = vsel %vm431_vm9, %v546_v32, 0.0 }
 0x2f1   :  { %556 = vadd.xlane.f32.xlu2 %v555_v21  ;;  %495 = vadd.xlane.f32.xlu0 %v494_v24 }
 0x2f2   :  { %527 = vadd.xlane.f32.xlu1 %v526_v27  ;;  %v446_v22 = vpop.xlane.xlu2 %445 }
 0x2f3   :  { %v460_v29 = vsub.f32 %v1520_v30, %v446_v22 }
 0x2f5   :  { %v1610_v33 = vpop.eup %1025  ;;  %v472_v61 = vmul.f32 1.442695, %v460_v29 }
 0x2f6   :  { %v483_v38 = vmul.f32 %v1610_v33, %v1462_v8  ;;  %v515_v5 = vmul.f32 %v1610_v33, %v1467_v9  ;;  %v547_v2 = vmul.f32 %v1610_v33, %v1474_v12 }
 0x2f7   :  { %1027 = vpow2.f32 %v472_v61 }
 0x2f8   :  { %v497_v48 = vsel %vm431_vm9, %v483_v38, 0.0  ;;  %v529_v57 = vsel %vm431_vm9, %v515_v5, 0.0  ;;  %v561_v15 = vsel %vm431_vm9, %v547_v2, 0.0 }
 0x2f9   :  { %559 = vadd.xlane.f32.xlu2 %v558_v46  ;;  %498 = vadd.xlane.f32.xlu0 %v497_v48 }
 0x2fa   :  { %530 = vadd.xlane.f32.xlu1 %v529_v57  ;;  %v449_v30 = vpop.xlane.xlu0 %448 }
 0x2fb   :  { %v461_v62 = vsub.f32 %v1542_v44, %v449_v30 }
 0x2fd   :  { %v1622_v4 = vpop.eup %1027  ;;  %v474_v14 = vmul.f32 1.442695, %v461_v62 }
 0x2fe   :  { %v484_v6 = vmul.f32 %v1622_v4, %v1484_v17  ;;  %v516_v11 = vmul.f32 %v1622_v4, %v1489_v18  ;;  %v548_v24 = vmul.f32 %v1622_v4, %v1496_v20 }
 0x2ff   :  { %1029 = vpow2.f32 %v474_v14 }
 0x300   :  { %v500_v16 = vsel %vm431_vm9, %v484_v6, 0.0  ;;  %v532_v19 = vsel %vm431_vm9, %v516_v11, 0.0  ;;  %v564_v61 = vsel %vm431_vm9, %v548_v24, 0.0 }
 0x301   :  { %562 = vadd.xlane.f32.xlu2 %v561_v15  ;;  %501 = vadd.xlane.f32.xlu0 %v500_v16 }
 0x302   :  { %533 = vadd.xlane.f32.xlu1 %v532_v19  ;;  %v452_v44 = vpop.xlane.xlu1 %451 }
 0x303   :  { %v462_v21 = vsub.f32 %v1564_v63, %v452_v44 }
 0x305   :  { %v1634_v27 = vpop.eup %1029  ;;  %v476_v22 = vmul.f32 1.442695, %v462_v21 }
 0x306   :  { %v485_v29 = vmul.f32 %v1634_v27, %v1506_v25  ;;  %v517_v32 = vmul.f32 %v1634_v27, %v1511_v26  ;;  %v549_v48 = vmul.f32 %v1634_v27, %v1518_v28 }
 0x307   :  { %1031 = vpow2.f32 %v476_v22 }
 0x308   :  { %v503_v38 = vsel %vm431_vm9, %v485_v29, 0.0  ;;  %v535_v5 = vsel %vm431_vm9, %v517_v32, 0.0  ;;  %v567_v14 = vsel %vm431_vm9, %v549_v48, 0.0 }
 0x309   :  { %565 = vadd.xlane.f32.xlu2 %v564_v61  ;;  %504 = vadd.xlane.f32.xlu0 %v503_v38 }
 0x30a   :  { %536 = vadd.xlane.f32.xlu1 %v535_v5  ;;  %v455_v63 = vpop.xlane.xlu1 %454  ;;  %v592_v5 = vmul.f32 0.5, %v1405_v50 }
 0x30b   :  { %v463_v46 = vsub.f32 %v1569_v7, %v455_v63 }
 0x30d   :  { %v1646_v57 = vpop.eup %1031  ;;  %v478_v30 = vmul.f32 1.442695, %v463_v46 }
 0x30e   :  { %v486_v62 = vmul.f32 %v1646_v57, %v1528_v34  ;;  %v518_v2 = vmul.f32 %v1646_v57, %v1533_v36  ;;  %v550_v7 = vmul.f32 %v1646_v57, %v1540_v40 }
 0x30f   :  { %1033 = vpow2.f32 %v478_v30 }
 0x310   :  { %v506_v6 = vsel %vm431_vm9, %v486_v62, 0.0  ;;  %v538_v11 = vsel %vm431_vm9, %v518_v2, 0.0  ;;  %v570_v44 = vsel %vm431_vm9, %v550_v7, 0.0  ;;  %v624_v62 = vmul.f32 1.5, %v1412_v52 }
 0x311   :  { %568 = vadd.xlane.f32.xlu2 %v567_v14  ;;  %507 = vadd.xlane.f32.xlu0 %v506_v6  ;;  %v593_v7 = vmul.f32 0.5, %v1423_v56 }
 0x312   :  { %539 = vadd.xlane.f32.xlu1 %v538_v11 }
 0x315   :  { %v1657_v15 = vpop.eup %1033 }
 0x316   :  { %v519_v16 = vmul.f32 %v1657_v15, %v1555_v53  ;;  %v487_v19 = vmul.f32 %v1657_v15, %v1550_v51  ;;  %v551_v22 = vmul.f32 %v1657_v15, %v1562_v59 }
 0x318   :  { %v541_v21 = vsel %vm431_vm9, %v519_v16, 0.0  ;;  %v509_v24 = vsel %vm431_vm9, %v487_v19, 0.0  ;;  %v573_v29 = vsel %vm431_vm9, %v551_v22, 0.0 }
 0x319   :  { %571 = vadd.xlane.f32.xlu2 %v570_v44  ;;  %510 = vadd.xlane.f32.xlu0 %v509_v24 }
 0x31a   :  { %542 = vadd.xlane.f32.xlu1 %v541_v21 }
 0x321   :  { %574 = vadd.xlane.f32.xlu2 %v573_v29  ;;  %v625_v29 = vmul.f32 1.5, %v1430_v58 }
 0x354   :  { %v490_v32 = vpop.xlane.xlu2 %489  ;;  %v522_v61 = vpop.xlane.xlu0 %521 }
 0x355   :  { %1035 = vrcp.f32 %v490_v32 }
 0x356   :  { %1037 = vrcp.f32 %v522_v61 }
 0x35b   :  { %v1036_v38 = vpop.eup %1035 }
 0x35c   :  { %v554_v63 = vpop.xlane.xlu2 %553  ;;  %v493_v46 = vpop.xlane.xlu0 %492  ;;  %v584_v2 = vmul.f32 %v1036_v38, %v1400_v49  ;;  %v594_v38 = vmul.f32 0.5, %v1445_v1 }
 0x35d   :  { %v1038_v48 = vpop.eup %1037  ;;  %1039 = vrcp.f32 %v554_v63  ;;  %v525_v30 = vpop.xlane.xlu1 %524 }
 0x35e   :  { %1041 = vrcp.f32 %v493_v46  ;;  %v608_v14 = vmul.f32 %v1038_v48, %v592_v5 }
 0x35f   :  { %1043 = vrcp.f32 %v525_v30 }
 0x360   :  { %v616_v16 = vadd.f32 %v608_v14, %v584_v2 }
 0x363   :  { %v1040_v6 = vpop.eup %1039 }
 0x364   :  { %v1042_v11 = vpop.eup %1041  ;;  %v640_v19 = vmul.f32 %v1040_v6, %v624_v62  ;;  %v557_v44 = vpop.xlane.xlu2 %556 }
 0x365   :  { %v496_v50 = vpop.xlane.xlu0 %495  ;;  %v1044_v21 = vpop.eup %1043  ;;  %1045 = vrcp.f32 %v557_v44  ;;  %v585_v52 = vmul.f32 %v1042_v11, %v1418_v54  ;;  %v626_v54 = vmul.f32 1.5, %v1452_v3  ;;  %v595_v11 = vmul.f32 0.5, %v1467_v9 }
 0x366   :  { %v528_v24 = vpop.xlane.xlu1 %527  ;;  %1047 = vrcp.f32 %v496_v50  ;;  %v648_v22 = vadd.f32 %v640_v19, %v616_v16  ;;  %v609_v49 = vmul.f32 %v1044_v21, %v593_v7 }
 0x367   :  { %1049 = vrcp.f32 %v528_v24 }
 0x368   :  { %v656_v32 = vmul.f32 %v1575_v23, %v648_v22  ;;  %v617_v48 = vadd.f32 %v609_v49, %v585_v52  ;;  %v596_v52 = vmul.f32 0.5, %v1489_v18 }
 0x36a   :  { %985 = vmatmul.msk.f32.vlgmr.msrb.gmra.mxu0 %vm431_vm9, %v656_v32 }
 0x36b   :  { %v1046_v56 = vpop.eup %1045 }
 0x36c   :  { %v1048_v61 = vpop.eup %1047  ;;  %v641_v5 = vmul.f32 %v1046_v56, %v625_v29  ;;  %v560_v63 = vpop.xlane.xlu2 %559 }
 0x36d   :  { %v499_v46 = vpop.xlane.xlu0 %498  ;;  %v1050_v30 = vpop.eup %1049  ;;  %1051 = vrcp.f32 %v560_v63  ;;  %v586_v23 = vmul.f32 %v1048_v61, %v1440_v0  ;;  %v627_v0 = vmul.f32 1.5, %v1474_v12 }
 0x36e   :  { %v531_v62 = vpop.xlane.xlu1 %530  ;;  %1053 = vrcp.f32 %v499_v46  ;;  %v649_v58 = vadd.f32 %v641_v5, %v617_v48  ;;  %v610_v2 = vmul.f32 %v1050_v30, %v594_v38  ;;  %v597_v30 = vmul.f32 0.5, %v1511_v26 }
 0x36f   :  { %1055 = vrcp.f32 %v531_v62 }
 0x370   :  { %v657_v14 = vmul.f32 %v1586_v42, %v649_v58  ;;  %v618_v44 = vadd.f32 %v610_v2, %v586_v23 }
 0x372   :  { %986 = vmatmul.msk.f32.gmra.mxu0 %vm431_vm9, %v657_v14 }
 0x373   :  { %v1052_v1 = vpop.eup %1051 }
 0x374   :  { %v1054_v6 = vpop.eup %1053  ;;  %v642_v7 = vmul.f32 %v1052_v1, %v626_v54  ;;  %v563_v16 = vpop.xlane.xlu2 %562 }
 0x375   :  { %v502_v19 = vpop.xlane.xlu0 %501  ;;  %v1056_v50 = vpop.eup %1055  ;;  %1057 = vrcp.f32 %v563_v16  ;;  %v587_v42 = vmul.f32 %v1054_v6, %v1462_v8  ;;  %v628_v8 = vmul.f32 1.5, %v1496_v20 }
 0x376   :  { %v534_v21 = vpop.xlane.xlu1 %533  ;;  %1059 = vrcp.f32 %v502_v19  ;;  %v650_v3 = vadd.f32 %v642_v7, %v618_v44  ;;  %v611_v24 = vmul.f32 %v1056_v50, %v595_v11  ;;  %v598_v7 = vmul.f32 0.5, %v1533_v36 }
 0x377   :  { %1061 = vrcp.f32 %v534_v21 }
 0x378   :  { %v658_v22 = vmul.f32 %v1598_v13, %v650_v3  ;;  %v619_v61 = vadd.f32 %v611_v24, %v587_v42 }
 0x37a   :  { %987 = vmatmul.msk.f32.gmra.mxu0 %vm431_vm9, %v658_v22  ;;  %v599_v22 = vmul.f32 0.5, %v1555_v53 }
 0x37b   :  { %v1058_v9 = vpop.eup %1057 }
 0x37c   :  { %v1060_v29 = vpop.eup %1059  ;;  %v643_v49 = vmul.f32 %v1058_v9, %v627_v0  ;;  %v566_v32 = vpop.xlane.xlu2 %565 }
 0x37d   :  { %v505_v56 = vpop.xlane.xlu0 %504  ;;  %v1062_v38 = vpop.eup %1061  ;;  %1063 = vrcp.f32 %v566_v32  ;;  %v588_v13 = vmul.f32 %v1060_v29, %v1484_v17  ;;  %v629_v17 = vmul.f32 1.5, %v1518_v28 }
 0x37e   :  { %v537_v5 = vpop.xlane.xlu1 %536  ;;  %1065 = vrcp.f32 %v505_v56  ;;  %v651_v12 = vadd.f32 %v643_v49, %v619_v61  ;;  %v612_v63 = vmul.f32 %v1062_v38, %v596_v52  ;;  %v631_v56 = vmul.f32 1.5, %v1562_v59  ;;  %v744_v59 = vld [vmem:[%s1810_s11 + $0x8] sm:$0xff] }
 0x37f   :  { %1067 = vrcp.f32 %v537_v5 }
 0x380   :  { %v659_v46 = vmul.f32 %v1610_v33, %v651_v12  ;;  %v620_v23 = vadd.f32 %v612_v63, %v588_v13 }
 0x382   :  { %988 = vmatmul.msk.f32.gmra.mxu0 %vm431_vm9, %v659_v46 }
 0x383   :  { %v1064_v18 = vpop.eup %1063 }
 0x384   :  { %v1066_v48 = vpop.eup %1065  ;;  %v644_v62 = vmul.f32 %v1064_v18, %v628_v8  ;;  %v569_v58 = vpop.xlane.xlu2 %568  ;;  %v746_v8 = vld [vmem:[%s1810_s11 + $0x18] sm:$0xff] }
 0x385   :  { %v508_v54 = vpop.xlane.xlu0 %507  ;;  %v1068_v2 = vpop.eup %1067  ;;  %1069 = vrcp.f32 %v569_v58  ;;  %v589_v33 = vmul.f32 %v1066_v48, %v1506_v25  ;;  %v630_v25 = vmul.f32 1.5, %v1540_v40  ;;  %769 = vmatpush.msrb.mxu1 %v746_v8 }
 0x386   :  { %v540_v14 = vpop.xlane.xlu1 %539  ;;  %1071 = vrcp.f32 %v508_v54  ;;  %v652_v20 = vadd.f32 %v644_v62, %v620_v23  ;;  %v613_v1 = vmul.f32 %v1068_v2, %v597_v30 }
 0x387   :  { %1073 = vrcp.f32 %v540_v14 }
 0x388   :  { %v660_v6 = vmul.f32 %v1622_v4, %v652_v20  ;;  %v621_v50 = vadd.f32 %v613_v1, %v589_v33 }
 0x38a   :  { %989 = vmatmul.msk.f32.gmra.mxu0 %vm431_vm9, %v660_v6 }
 0x38b   :  { %v1070_v26 = vpop.eup %1069 }
 0x38c   :  { %v1072_v11 = vpop.eup %1071  ;;  %v645_v16 = vmul.f32 %v1070_v26, %v629_v17  ;;  %v572_v19 = vpop.xlane.xlu2 %571 }
 0x38d   :  { %v511_v44 = vpop.xlane.xlu0 %510  ;;  %v1074_v21 = vpop.eup %1073  ;;  %1075 = vrcp.f32 %v572_v19  ;;  %v590_v4 = vmul.f32 %v1072_v11, %v1528_v34 }
 0x38e   :  { %v543_v3 = vpop.xlane.xlu1 %542  ;;  %1077 = vrcp.f32 %v511_v44  ;;  %v653_v28 = vadd.f32 %v645_v16, %v621_v50  ;;  %v614_v0 = vmul.f32 %v1074_v21, %v598_v7  ;;  %v841_v44 = vld [vmem:[%s1816_s17 + $0x18] sm:$0xff]  ;;  %v840_v50 = vld [vmem:[%s1816_s17 + $0x10] sm:$0xff] }
 0x38f   :  { %1079 = vrcp.f32 %v543_v3  ;;  %864 = vmatpush.msrb.mxu2 %v841_v44 }
 0x390   :  { %v661_v42 = vmul.f32 %v1634_v27, %v653_v28  ;;  %v622_v52 = vadd.f32 %v614_v0, %v590_v4 }
 0x391   :  { %865 = vmatpush.msrb.mxu2 %v840_v50 }
 0x392   :  { %990 = vmatmul.msk.f32.gmra.mxu0 %vm431_vm9, %v661_v42 }
 0x393   :  { %v1076_v36 = vpop.eup %1075 }
 0x394   :  { %v1078_v24 = vpop.eup %1077  ;;  %v646_v9 = vmul.f32 %v1076_v36, %v630_v25  ;;  %v575_v29 = vpop.xlane.xlu2 %574 }
 0x395   :  { %v1080_v49 = vpop.eup %1079  ;;  %1081 = vrcp.f32 %v575_v29  ;;  %v591_v40 = vmul.f32 %v1078_v24, %v1550_v51  ;;  %v745_v51 = vld [vmem:[%s1810_s11 + $0x10] sm:$0xff]  ;;  %v839_v24 = vld [vmem:[%s1816_s17 + $0x8] sm:$0xff] }
 0x396   :  { %v654_v32 = vadd.f32 %v646_v9, %v622_v52  ;;  %v615_v34 = vmul.f32 %v1080_v49, %v599_v22  ;;  %770 = vmatpush.msrb.mxu1 %v745_v51  ;;  %866 = vmatpush.msrb.mxu2 %v839_v24  ;;  %v838_v22 = vld [vmem:[%s1816_s17] sm:$0xff]  ;;  %v884_v49 = vld [vmem:[%s1818_s19 + $0x38] sm:$0xff] }
 0x398   :  { %v662_v61 = vmul.f32 %v1646_v57, %v654_v32  ;;  %v623_v5 = vadd.f32 %v615_v34, %v591_v40  ;;  %771 = vmatpush.msrb.mxu1 %v744_v59  ;;  %867 = vmatpush.msrb.mxu2 %v838_v22  ;;  %v883_v32 = vld [vmem:[%s1818_s19 + $0x30] sm:$0xff] }
 0x39a   :  { %991 = vmatmul.msk.f32.gmra.mxu0 %vm431_vm9, %v662_v61  ;;  %v881_v61 = vld [vmem:[%s1818_s19 + $0x20] sm:$0xff] }
 0x39b   :  { %v1082_v27 = vpop.eup %1081 }
 0x39c   :  { %v647_v38 = vmul.f32 %v1082_v27, %v631_v56  ;;  %v882_v56 = vld [vmem:[%s1818_s19 + $0x28] sm:$0xff] }
 0x39e   :  { %v655_v12 = vadd.f32 %v647_v38, %v623_v5  ;;  %v880_v5 = vld [vmem:[%s1818_s19 + $0x18] sm:$0xff] }
 0x3a0   :  { %v663_v53 = vmul.f32 %v1657_v15, %v655_v12  ;;  %v743_v15 = vld [vmem:[%s1810_s11] sm:$0xff] }
 0x3a1   :  { %772 = vmatpush.msrb.mxu1 %v743_v15  ;;  %v1009_v15 = vld [vmem:[%s1814_s15] ss:$0 sm:$0xff] }
 0x3a2   :  { %992 = vmatmul.msk.f32.gmra.mxu0 %vm431_vm9, %v663_v53  ;;  %v879_v53 = vld [vmem:[%s1818_s19 + $0x10] sm:$0xff] }
 0x3a3   :  { %904 = vmatpush.msra.mxu1 %v884_v49 }
 0x3a5   :  { %905 = vmatpush.msra.mxu1 %v883_v32 }
 0x3a7   :  { %906 = vmatpush.msra.mxu1 %v882_v56 }
 0x3a9   :  { %907 = vmatpush.msra.mxu1 %v881_v61 }
 0x3ab   :  { %908 = vmatpush.msra.mxu1 %v880_v5 }
 0x3ad   :  { %909 = vmatpush.msra.mxu1 %v879_v53 }
 0x3e7   :  { %v705_v57 = vpop.f32.mrf.mxu0 }
 0x3e8   :  { %v729_v62 = vmul.f32 %v705_v57, %v1343_v31 }
 0x3ef   :  { %v708_v13 = vpop.f32.mrf.mxu0 }
 0x3f0   :  { %v730_v33 = vmul.f32 %v708_v13, %v1351_v35 }
 0x3f7   :  { %v711_v63 = vpop.f32.mrf.mxu0 }
 0x3f8   :  { %v731_v30 = vmul.f32 %v711_v63, %v1358_v37 }
 0x3fa   :  { %v737_v54 = vadd.f32 %v731_v30, %v729_v62 }
 0x3ff   :  { %v714_v46 = vpop.f32.mrf.mxu0 }
 0x400   :  { %v732_v20 = vmul.f32 %v714_v46, %v1365_v39 }
 0x402   :  { %v738_v6 = vadd.f32 %v732_v20, %v730_v33  ;;  %v878_v33 = vld [vmem:[%s1818_s19 + $0x8] sm:$0xff] }
 0x403   :  { %910 = vmatpush.msra.mxu1 %v878_v33 }
 0x407   :  { %v717_v18 = vpop.f32.mrf.mxu0 }
 0x408   :  { %v733_v58 = vmul.f32 %v717_v18, %v1372_v41 }
 0x40a   :  { %v739_v2 = vadd.f32 %v737_v54, %v733_v58 }
 0x40f   :  { %v720_v48 = vpop.f32.mrf.mxu0 }
 0x410   :  { %v734_v1 = vmul.f32 %v720_v48, %v1379_v43  ;;  %v1010_v48 = vld [vmem:[%s1815_s16] ss:$0 sm:$0xff] }
 0x412   :  { %v740_v26 = vadd.f32 %v738_v6, %v734_v1  ;;  %v877_v1 = vld [vmem:[%s1818_s19] sm:$0xff]  ;;  %s1114_s19 = smov [#allocation2]  }
 0x413   :  { %911 = vmatpush.msra.mxu1 %v877_v1  ;;  %v1011_v6 = vld [vmem:[%s1817_s18] ss:$0 sm:$0xff]  ;;  %s927_s18 = sshll.u32 %s1114_s19, 4  ;;  %s928_s18 = int_to_ptr.vmem [resolvable:$true] %s927_s18 }
 0x417   :  { %v723_v23 = vpop.f32.mrf.mxu0 }
 0x418   :  { %v735_v14 = vmul.f32 %v723_v23, %v1386_v45  ;;  %v1008_v45 = vld [vmem:[%s1811_s12] ss:$0 sm:$0xff] }
 0x41a   :  { %v741_v17 = vadd.f32 %v739_v2, %v735_v14 }
 0x41c   :  { %993 = vmatmul.msk.f32.vlgmr.msrb.gmra.mxu1 %vm73_vm0, %v741_v17 }
 0x41f   :  { %v726_v37 = vpop.f32.mrf.mxu0 }
 0x420   :  { %v736_v31 = vmul.f32 %v726_v37, %v1393_v47 }
 0x422   :  { %v742_v41 = vadd.f32 %v740_v26, %v736_v31 }
 0x424   :  { %994 = vmatmul.msk.f32.gmra.mxu1 %vm73_vm0, %v742_v41 }
 0x499   :  { %v774_v39 = vpop.f32.mrf.mxu1 }
 0x49a   :  { %v775_v11 = vadd.f32 %v1008_v45, %v774_v39 }
 0x49c   :  { %v780_v35 = vadd.f32 %v775_v11, %v1289_v55  ;;  %v1012_v11 = vld [vmem:[%s1819_s20] ss:$0 sm:$0xff]  ;;  %s1116_s20 = smov 8  }
 0x49e   :  { %v784_v43 = vsel %vm73_vm0, %v780_v35, 0.0 }
 0x49f   :  { %785 = vadd.xlane.f32.xlu0 %v784_v43 }
 0x4a1   :  { %v777_v7 = vpop.f32.mrf.mxu1 }
 0x4a2   :  { %v778_v16 = vadd.f32 %v1008_v45, %v777_v7 }
 0x4a4   :  { %v781_v19 = vadd.f32 %v778_v16, %v1298_v60 }
 0x4a6   :  { %v787_v47 = vsel %vm73_vm0, %v781_v19, 0.0 }
 0x4a7   :  { %788 = vadd.xlane.f32.xlu1 %v787_v47 }
 0x512   :  { %v786_v55 = vpop.xlane.xlu0 %785 }
 0x513   :  { %v790_v21 = vmul.f32 %v786_v55, %v1235_v10 }
 0x515   :  { %v792_v3 = vsub.f32 %v780_v35, %v790_v21 }
 0x517   :  { %v794_v28 = vmul.f32 %v792_v3, %v792_v3 }
 0x519   :  { %v796_v60 = vsel %vm73_vm0, %v794_v28, 0.0 }
 0x51a   :  { %797 = vadd.xlane.f32.xlu2 %v796_v60  ;;  %v789_v25 = vpop.xlane.xlu1 %788 }
 0x51b   :  { %v791_v4 = vmul.f32 %v789_v25, %v1235_v10 }
 0x51d   :  { %v793_v0 = vsub.f32 %v781_v19, %v791_v4 }
 0x51f   :  { %v795_v42 = vmul.f32 %v793_v0, %v793_v0 }
 0x521   :  { %v799_v36 = vsel %vm73_vm0, %v795_v42, 0.0 }
 0x522   :  { %800 = vadd.xlane.f32.xlu0 %v799_v36 }
 0x58d   :  { %v798_v9 = vpop.xlane.xlu2 %797 }
 0x58e   :  { %v802_v29 = vmul.f32 %v798_v9, %v1235_v10 }
 0x590   :  { %v804_v52 = vadd.f32 1e-05, %v802_v29 }
 0x592   :  { %1083 = vrsqrt.f32 %v804_v52  ;;  %vm812_vm3 = vweird.f32 %v804_v52 }
 0x595   :  { %v801_v40 = vpop.xlane.xlu0 %800 }
 0x596   :  { %v803_v34 = vmul.f32 %v801_v40, %v1235_v10 }
 0x598   :  { %v1084_v27 = vpop.eup %1083  ;;  %v805_v38 = vadd.f32 1e-05, %v803_v34 }
 0x599   :  { %v807_v12 = vmul.f32 %v1084_v27, %v804_v52  ;;  %vm813_vm2 = vweird.f32 %v1084_v27 }
 0x59a   :  { %1085 = vrsqrt.f32 %v805_v38  ;;  %vm814_vm4 = vmor %vm812_vm3, %vm813_vm2  ;;  %vm822_vm6 = vweird.f32 %v805_v38 }
 0x59b   :  { %v808_v8 = vmul.f32 %v1084_v27, %v807_v12 }
 0x59d   :  { %v809_v10 = vmul.f32 0.5, %v808_v8 }
 0x59f   :  { %v810_v51 = vsub.f32 1.5, %v809_v10 }
 0x5a0   :  { %v1086_v59 = vpop.eup %1085 }
 0x5a1   :  { %v811_v57 = vmul.f32 %v1084_v27, %v810_v51  ;;  %v817_v13 = vmul.f32 %v1086_v59, %v805_v38  ;;  %vm823_vm5 = vweird.f32 %v1086_v59 }
 0x5a2   :  { %vm824_vm7 = vmor %vm822_vm6, %vm823_vm5 }
 0x5a3   :  { %v815_v63 = vsel %vm814_vm4, %v1084_v27, %v811_v57  ;;  %v818_v46 = vmul.f32 %v1086_v59, %v817_v13 }
 0x5a4   :  { %v826_v18 = vmul.f32 %v815_v63, %v792_v3 }
 0x5a5   :  { %v819_v30 = vmul.f32 0.5, %v818_v46 }
 0x5a6   :  { %v831_v62 = vmul.f32 %v1009_v15, %v826_v18 }
 0x5a7   :  { %v820_v58 = vsub.f32 1.5, %v819_v30 }
 0x5a8   :  { %v836_v54 = vadd.f32 %v1010_v48, %v831_v62 }
 0x5a9   :  { %v821_v23 = vmul.f32 %v1086_v59, %v820_v58 }
 0x5aa   :  { %995 = vmatmul.msk.f32.vlgmr.msrb.gmra.mxu2 %vm73_vm0, %v836_v54 }
 0x5ab   :  { %v825_v2 = vsel %vm824_vm7, %v1086_v59, %v821_v23 }
 0x5ac   :  { %v827_v14 = vmul.f32 %v825_v2, %v793_v0 }
 0x5ae   :  { %v832_v20 = vmul.f32 %v1009_v15, %v827_v14 }
 0x5b0   :  { %v837_v17 = vadd.f32 %v1010_v48, %v832_v20 }
 0x5b2   :  { %996 = vmatmul.msk.f32.gmra.mxu2 %vm73_vm0, %v837_v17 }
 0x62d   :  { %v869_v37 = vpop.f32.mrf.mxu2 }
 0x62e   :  { %v870_v26 = vadd.f32 %v1011_v6, %v869_v37 }
 0x630   :  { %v875_v31 = vmax.f32 %v870_v26, 0.0 }
 0x632   :  { %997 = vmatmul.msk.f32.vlgmr.msra.gmra.mxu1 %vm889_vm8, %v875_v31 }
 0x635   :  { %v872_v41 = vpop.f32.mrf.mxu2 }
 0x636   :  { %v873_v45 = vadd.f32 %v1011_v6, %v872_v41 }
 0x638   :  { %v876_v39 = vmax.f32 %v873_v45, 0.0 }
 0x63a   :  { %998 = vmatmul.msk.f32.gmra.mxu1 %vm889_vm8, %v876_v39 }
 0x6af   :  { %v913_v35 = vpop.f32.mrf.mxu1 }
 0x6b0   :  { %v914_v43 = vadd.f32 %v1012_v11, %v913_v35 }
 0x6b2   :  { %v919_v7 = vadd.f32 %v914_v43, %v836_v54 }
 0x6b4   :  { %921 = vst.msk [vmem:[#allocation2] sm:$0xff] %vm73_vm0, %v919_v7 }
 0x6b7   :  { %v916_v16 = vpop.f32.mrf.mxu1 }
 0x6b8   :  { %v917_v19 = vadd.f32 %v1012_v11, %v916_v16 }
 0x6ba   :  { %v920_v47 = vadd.f32 %v917_v19, %v837_v17 }
 0x6bc   :  { %922 = vst.msk [vmem:[#allocation2 + $0x8] sm:$0xff] %vm73_vm0, %v920_v47 }
 0x6bd   :  { %935 = dma.vmem_to_hbm [thread:$0]  %s928_s18, 256, %s930_s22, [#allocation3], %s1115_s23, %s1115_s23, %s1116_s20  }
 0x6be   :  { %1111 = dma.done.wait [#allocation3], 256  }
 0x6bf   :  { %1112 = vsyncadd [#allocation3], 4294967040 }
 0x6c0   :  { %940 = vsyncpa [#allocation3], 1 }

</bundles_post_ra>
